<compile_context>
chip_gen: v5e
topology: v5e:2x2
jax: 0.10.0
libtpu: 0.0.40
codegen_flags: <defaults>
</compile_context>

<pallas_src>
import functools

import jax
import jax.numpy as jnp
from jax.experimental import pallas as pl
from jax.experimental.pallas import tpu as pltpu


def _bottleneck_kernel(H, W, stride, TH,
                       x_ref, w1_ref, s1_ref, b1_ref,
                       w2_ref, s2_ref, b2_ref,
                       w3_ref, s3_ref, b3_ref,
                       wd_ref, sd_ref, bd_ref,
                       o_ref):
    Cin = x_ref.shape[-1]
    P = w1_ref.shape[-1]
    Cout = 2 * P
    Wp = W + 2                               # wrapper-padded width
    Ho = (H - 1) // stride + 1
    Wo = (W - 1) // stride + 1
    Lw = (TH - 1) * stride + 3               # input-window rows for TH output rows
    rend = (TH - 1) * stride + 1
    cend = (Wo - 1) * stride + 1

    t = pl.program_id(1)
    w0 = pl.multiple_of(t * (TH * stride), TH * stride)   # window start (padded rows)

    # Input row window (bf16); includes the zero-pad rows/cols added in the wrapper.
    xw = x_ref[0, pl.ds(w0, Lw), :, :]                    # (Lw, Wp, Cin)

    # ---- conv1 (1x1) + bn1 + relu : channel matmul on the MXU, f32 epilogue ----
    h1 = jnp.dot(xw.reshape(Lw * Wp, Cin), w1_ref[...],
                 preferred_element_type=jnp.float32)
    h1 = jnp.maximum(h1 * s1_ref[...] + b1_ref[...], 0.0).reshape(Lw, Wp, P)
    # conv2's zero padding: the padded x rows/cols went through bn1 (bias != 0),
    # so force them back to exact zero with an iota mask (no pad scratch).
    rid = jax.lax.broadcasted_iota(jnp.int32, (Lw, Wp, P), 0) + w0
    cid = jax.lax.broadcasted_iota(jnp.int32, (Lw, Wp, P), 1)
    pad_mask = (rid == 0) | (rid == H + 1) | (cid == 0) | (cid == W + 1)
    h1 = jnp.where(pad_mask, 0.0, h1)

    # ---- downsample branch first (lets the input window die early) ----
    if stride == 1:
        xs = xw[1:1 + TH, 1:1 + W, :]
    else:
        xs = xw[1:1 + rend:stride, 1:1 + cend:stride, :]
    res = jnp.dot(xs.reshape(TH * Wo, Cin), wd_ref[...],
                  preferred_element_type=jnp.float32)
    res = res * sd_ref[...] + bd_ref[...]

    # ---- conv2 (3x3, stride, pad=1) + bn2 + relu ----
    # Concatenate the three horizontal taps on the channel axis -> K = 3P,
    # then one matmul per kernel row (3 deep matmuls instead of 9 shallow ones).
    if stride == 1:
        taps = [h1[:, dx:dx + Wo, :] for dx in range(3)]
    else:
        taps = [h1[:, dx:dx + cend:stride, :] for dx in range(3)]
    big = jnp.concatenate(taps, axis=-1).astype(w2_ref.dtype)   # (Lw, Wo, 3P) bf16

    def row_tap(dy):
        if stride == 1:
            rows = big[dy:dy + TH]
        else:
            rows = big[dy:dy + rend:stride]
        return rows.reshape(TH * Wo, 3 * P)

    acc = jnp.dot(row_tap(0), w2_ref[0], preferred_element_type=jnp.float32)
    acc = acc + jnp.dot(row_tap(1), w2_ref[1], preferred_element_type=jnp.float32)
    acc = acc + jnp.dot(row_tap(2), w2_ref[2], preferred_element_type=jnp.float32)
    h2 = jnp.maximum(acc * s2_ref[...] + b2_ref[...], 0.0)

    # ---- conv3 (1x1 -> 2*planes) + bn3 ----
    h3 = jnp.dot(h2.astype(w3_ref.dtype), w3_ref[...],
                 preferred_element_type=jnp.float32)
    h3 = h3 * s3_ref[...] + b3_ref[...]

    # ---- residual add + relu, single aligned full-block store ----
    out = jnp.maximum(h3 + res, 0.0)
    o_ref[...] = out.reshape(1, TH, Wo, Cout).astype(o_ref.dtype)


def bottleneck_forward(x_nchw, p, stride=1):
    N, Cin, H, W = x_nchw.shape
    P = p['w1'].shape[1]
    Cout = 2 * P
    Ho = (H - 1) // stride + 1
    Wo = (W - 1) // stride + 1

    # Output-row tile: the biggest of (8, 4, 2, 1) dividing Ho.  This gives a
    # second parallel grid axis and bounds the per-step VMEM working set.
    TH = next(d for d in (8, 4, 2, 1) if Ho % d == 0)
    nT = Ho // TH

    # NHWC, zero-pad H and W by 1 (conv2's padding), bf16 for the MXU.
    x = jnp.transpose(x_nchw, (0, 2, 3, 1)).astype(jnp.float32)
    x = jnp.pad(x, ((0, 0), (1, 1), (1, 1), (0, 0))).astype(jnp.bfloat16)

    w1 = p['w1'].astype(jnp.bfloat16)
    w2 = p['w2'].reshape(3, 3 * P, P).astype(jnp.bfloat16)   # (dy, dx*cin, cout)
    w3 = p['w3'].astype(jnp.bfloat16)
    wd = p['wd'].astype(jnp.bfloat16)

    kernel = functools.partial(_bottleneck_kernel, H, W, stride, TH)

    def full(shape):
        return pl.BlockSpec(shape, lambda n, t, _s=shape: (0,) * len(_s))

    out = pl.pallas_call(
        kernel,
        out_shape=jax.ShapeDtypeStruct((N, Ho, Wo, Cout), jnp.float32),
        grid_spec=pltpu.PrefetchScalarGridSpec(
            num_scalar_prefetch=0,
            grid=(N, nT),
            in_specs=[
                # Full padded image per batch element; block index is constant
                # over the row-tile axis, so it is DMA'd once per image.
                pl.BlockSpec((1, H + 2, W + 2, Cin), lambda n, t: (n, 0, 0, 0)),
                full((Cin, P)), full((1, P)), full((1, P)),
                full((3, 3 * P, P)), full((1, P)), full((1, P)),
                full((P, Cout)), full((1, Cout)), full((1, Cout)),
                full((Cin, Cout)), full((1, Cout)), full((1, Cout)),
            ],
            out_specs=pl.BlockSpec((1, TH, Wo, Cout), lambda n, t: (n, t, 0, 0)),
        ),
        compiler_params=pltpu.CompilerParams(
            dimension_semantics=("parallel", "parallel"),
            vmem_limit_bytes=64 * 1024 * 1024),
    )(x, w1, p['s1'], p['b1'],
      w2, p['s2'], p['b2'],
      w3, p['s3'], p['b3'],
      wd, p['sd'], p['bd'])

    return jnp.transpose(out, (0, 3, 1, 2))  # back to NCHW


def init_params(key, inplanes, planes):
    ks = jax.random.split(key, 20)
    eps = 1e-5

    def bn_fold(kg, kb, km, kv, c):
        gamma = 1.0 + 0.1 * jax.random.normal(kg, (c,), jnp.float32)
        beta = 0.1 * jax.random.normal(kb, (c,), jnp.float32)
        mean = 0.1 * jax.random.normal(km, (c,), jnp.float32)
        var = jax.random.uniform(kv, (c,), jnp.float32, 0.5, 1.5)
        scale = gamma / jnp.sqrt(var + eps)
        bias = beta - mean * scale
        return scale.reshape(1, c), bias.reshape(1, c)

    P, Cout = planes, 2 * planes
    s1, b1 = bn_fold(ks[0], ks[1], ks[2], ks[3], P)
    s2, b2 = bn_fold(ks[4], ks[5], ks[6], ks[7], P)
    s3, b3 = bn_fold(ks[8], ks[9], ks[10], ks[11], Cout)
    sd, bd = bn_fold(ks[12], ks[13], ks[14], ks[15], Cout)
    return {
        # weights stored as (Cin, Cout) for 1x1 convs, HWIO for the 3x3 conv
        'w1': 0.1 * jax.random.normal(ks[16], (inplanes, P), jnp.float32),
        'w2': 0.1 * jax.random.normal(ks[17], (3, 3, P, P), jnp.float32),
        'w3': 0.1 * jax.random.normal(ks[18], (P, Cout), jnp.float32),
        'wd': 0.1 * jax.random.normal(ks[19], (inplanes, Cout), jnp.float32),
        's1': s1, 'b1': b1, 's2': s2, 'b2': b2,
        's3': s3, 'b3': b3, 'sd': sd, 'bd': bd,
    }


def ref_forward(x_nchw, p, stride):
    """Pure-JAX f32 reference (lax convs) for correctness checking."""
    x = jnp.transpose(x_nchw, (0, 2, 3, 1)).astype(jnp.float32)
    dn = ('NHWC', 'HWIO', 'NHWC')
    conv = jax.lax.conv_general_dilated
    h = conv(x, p['w1'][None, None], (1, 1), 'VALID', dimension_numbers=dn)
    h = jnp.maximum(h * p['s1'] + p['b1'], 0.0)
    h = conv(h, p['w2'], (stride, stride), ((1, 1), (1, 1)),
             dimension_numbers=dn)
    h = jnp.maximum(h * p['s2'] + p['b2'], 0.0)
    h = conv(h, p['w3'][None, None], (1, 1), 'VALID', dimension_numbers=dn)
    h = h * p['s3'] + p['b3']
    r = conv(x, p['wd'][None, None], (stride, stride), 'VALID',
             dimension_numbers=dn)
    r = r * p['sd'] + p['bd']
    return jnp.transpose(jnp.maximum(h + r, 0.0), (0, 3, 1, 2))


if __name__ == "__main__":
    key = jax.random.PRNGKey(0)
    kx, kp = jax.random.split(key)

    N, inplanes, planes, H, W, stride = 2, 8, 4, 16, 16, 1
    x = jax.random.normal(kx, (N, inplanes, H, W), jnp.float32)
    params = init_params(kp, inplanes, planes)

    out = bottleneck_forward(x, params, stride=stride)
    out = jax.block_until_ready(out)

    ref = ref_forward(x, params, stride)
    assert out.shape == ref.shape == (N, 2 * planes, H, W)
    max_err = float(jnp.max(jnp.abs(out - ref)))
    # Matmul inputs are bf16 (f32 accumulation/epilogue), so allow a slightly
    # looser absolute tolerance than a pure-f32 comparison.
    if max_err > 3e-2:
        raise AssertionError(f"kernel/reference mismatch: max abs err {max_err}")

    print("KERNEL_OK")
</pallas_src>

<mosaic_0001>
module attributes {stable_mosaic.version = 11 : i64} {
  func.func @_bottleneck_kernel(%arg0: i32, %arg1: i32, %arg2: memref<1x18x18x8xbf16, #tpu.memory_space<vmem>>, %arg3: memref<8x4xbf16, #tpu.memory_space<vmem>>, %arg4: memref<1x4xf32, #tpu.memory_space<vmem>>, %arg5: memref<1x4xf32, #tpu.memory_space<vmem>>, %arg6: memref<3x12x4xbf16, #tpu.memory_space<vmem>>, %arg7: memref<1x4xf32, #tpu.memory_space<vmem>>, %arg8: memref<1x4xf32, #tpu.memory_space<vmem>>, %arg9: memref<4x8xbf16, #tpu.memory_space<vmem>>, %arg10: memref<1x8xf32, #tpu.memory_space<vmem>>, %arg11: memref<1x8xf32, #tpu.memory_space<vmem>>, %arg12: memref<8x8xbf16, #tpu.memory_space<vmem>>, %arg13: memref<1x8xf32, #tpu.memory_space<vmem>>, %arg14: memref<1x8xf32, #tpu.memory_space<vmem>>, %arg15: memref<1x8x16x8xf32, #tpu.memory_space<vmem>>) attributes {dimension_semantics = [#tpu.dimension_semantics<parallel>, #tpu.dimension_semantics<parallel>], iteration_bounds = array<i64: 2, 2>, scalar_prefetch = 0 : i64, scratch_operands = 0 : i64, tpu.core_type = #tpu.core_type<tc>, window_params = [{transform_indices = @transform_0, window_bounds = array<i64: 1, 18, 18, 8>}, {pipeline_mode = #tpu.pipeline_mode<synchronous>, transform_indices = @transform_1, window_bounds = array<i64: 8, 4>}, {pipeline_mode = #tpu.pipeline_mode<synchronous>, transform_indices = @transform_2, window_bounds = array<i64: 1, 4>}, {pipeline_mode = #tpu.pipeline_mode<synchronous>, transform_indices = @transform_3, window_bounds = array<i64: 1, 4>}, {pipeline_mode = #tpu.pipeline_mode<synchronous>, transform_indices = @transform_4, window_bounds = array<i64: 3, 12, 4>}, {pipeline_mode = #tpu.pipeline_mode<synchronous>, transform_indices = @transform_5, window_bounds = array<i64: 1, 4>}, {pipeline_mode = #tpu.pipeline_mode<synchronous>, transform_indices = @transform_6, window_bounds = array<i64: 1, 4>}, {pipeline_mode = #tpu.pipeline_mode<synchronous>, transform_indices = @transform_7, window_bounds = array<i64: 4, 8>}, {pipeline_mode = #tpu.pipeline_mode<synchronous>, transform_indices = @transform_8, window_bounds = array<i64: 1, 8>}, {pipeline_mode = #tpu.pipeline_mode<synchronous>, transform_indices = @transform_9, window_bounds = array<i64: 1, 8>}, {pipeline_mode = #tpu.pipeline_mode<synchronous>, transform_indices = @transform_10, window_bounds = array<i64: 8, 8>}, {pipeline_mode = #tpu.pipeline_mode<synchronous>, transform_indices = @transform_11, window_bounds = array<i64: 1, 8>}, {pipeline_mode = #tpu.pipeline_mode<synchronous>, transform_indices = @transform_12, window_bounds = array<i64: 1, 8>}, {transform_indices = @transform_13, window_bounds = array<i64: 1, 8, 16, 8>}]} {
    %c8_i32 = arith.constant 8 : i32
    %0 = arith.muli %arg1, %c8_i32 : i32
    %1 = tpu.assume_multiple %0, 8 : i32
    %c0 = arith.constant 0 : index
    %2 = arith.index_cast %1 : i32 to index
    %c0_0 = arith.constant 0 : index
    %c0_1 = arith.constant 0 : index
    %3 = vector.load %arg2[%c0, %2, %c0_0, %c0_1] : memref<1x18x18x8xbf16, #tpu.memory_space<vmem>>, vector<1x10x18x8xbf16>
    %4 = vector.shape_cast %3 : vector<1x10x18x8xbf16> to vector<10x18x8xbf16>
    %5 = vector.shape_cast %4 : vector<10x18x8xbf16> to vector<180x8xbf16>
    %c0_2 = arith.constant 0 : index
    %c0_3 = arith.constant 0 : index
    %6 = vector.load %arg3[%c0_2, %c0_3] : memref<8x4xbf16, #tpu.memory_space<vmem>>, vector<8x4xbf16>
    %cst = arith.constant dense<0.000000e+00> : vector<180x4xf32>
    %7 = tpu.matmul %5, %6, %cst {dimension_numbers = #tpu.dot_dimension_numbers<[1], [0], [0], [1], [0, 0, 1, 1], [], []>} : vector<180x8xbf16>, vector<8x4xbf16>, vector<180x4xf32> -> vector<180x4xf32>
    %c0_4 = arith.constant 0 : index
    %c0_5 = arith.constant 0 : index
    %8 = vector.load %arg4[%c0_4, %c0_5] : memref<1x4xf32, #tpu.memory_space<vmem>>, vector<1x4xf32>
    %9 = vector.broadcast %8 : vector<1x4xf32> to vector<180x4xf32>
    %10 = arith.mulf %7, %9 : vector<180x4xf32>
    %c0_6 = arith.constant 0 : index
    %c0_7 = arith.constant 0 : index
    %11 = vector.load %arg5[%c0_6, %c0_7] : memref<1x4xf32, #tpu.memory_space<vmem>>, vector<1x4xf32>
    %12 = vector.broadcast %11 : vector<1x4xf32> to vector<180x4xf32>
    %13 = arith.addf %10, %12 : vector<180x4xf32>
    %cst_8 = arith.constant 0.000000e+00 : f32
    %14 = vector.broadcast %cst_8 : f32 to vector<180x4xf32>
    %15 = arith.maximumf %13, %14 : vector<180x4xf32>
    %16 = vector.shape_cast %15 : vector<180x4xf32> to vector<10x18x4xf32>
    %17 = tpu.iota {dimensions = array<i32: 0>} : vector<10x18x4xi32>
    %18 = vector.broadcast %1 : i32 to vector<10x18x4xi32>
    %19 = arith.addi %17, %18 : vector<10x18x4xi32>
    %20 = tpu.iota {dimensions = array<i32: 1>} : vector<10x18x4xi32>
    %c0_i32 = arith.constant 0 : i32
    %21 = vector.broadcast %c0_i32 : i32 to vector<10x18x4xi32>
    %22 = arith.cmpi eq, %19, %21 : vector<10x18x4xi32>
    %c17_i32 = arith.constant 17 : i32
    %23 = vector.broadcast %c17_i32 : i32 to vector<10x18x4xi32>
    %24 = arith.cmpi eq, %19, %23 : vector<10x18x4xi32>
    %25 = arith.ori %22, %24 : vector<10x18x4xi1>
    %c0_i32_9 = arith.constant 0 : i32
    %26 = vector.broadcast %c0_i32_9 : i32 to vector<10x18x4xi32>
    %27 = arith.cmpi eq, %20, %26 : vector<10x18x4xi32>
    %28 = arith.ori %25, %27 : vector<10x18x4xi1>
    %c17_i32_10 = arith.constant 17 : i32
    %29 = vector.broadcast %c17_i32_10 : i32 to vector<10x18x4xi32>
    %30 = arith.cmpi eq, %20, %29 : vector<10x18x4xi32>
    %31 = arith.ori %28, %30 : vector<10x18x4xi1>
    %cst_11 = arith.constant 0.000000e+00 : f32
    %32 = vector.broadcast %cst_11 : f32 to vector<10x18x4xf32>
    %33 = arith.select %31, %32, %16 : vector<10x18x4xi1>, vector<10x18x4xf32>
    %34 = vector.extract_strided_slice %4 {offsets = [1, 1, 0], sizes = [8, 16, 8], strides = [1, 1, 1]} : vector<10x18x8xbf16> to vector<8x16x8xbf16>
    %35 = vector.shape_cast %34 : vector<8x16x8xbf16> to vector<128x8xbf16>
    %c0_12 = arith.constant 0 : index
    %c0_13 = arith.constant 0 : index
    %36 = vector.load %arg12[%c0_12, %c0_13] : memref<8x8xbf16, #tpu.memory_space<vmem>>, vector<8x8xbf16>
    %cst_14 = arith.constant dense<0.000000e+00> : vector<128x8xf32>
    %37 = tpu.matmul %35, %36, %cst_14 {dimension_numbers = #tpu.dot_dimension_numbers<[1], [0], [0], [1], [0, 0, 1, 1], [], []>} : vector<128x8xbf16>, vector<8x8xbf16>, vector<128x8xf32> -> vector<128x8xf32>
    %c0_15 = arith.constant 0 : index
    %c0_16 = arith.constant 0 : index
    %38 = vector.load %arg13[%c0_15, %c0_16] : memref<1x8xf32, #tpu.memory_space<vmem>>, vector<1x8xf32>
    %39 = vector.broadcast %38 : vector<1x8xf32> to vector<128x8xf32>
    %40 = arith.mulf %37, %39 : vector<128x8xf32>
    %c0_17 = arith.constant 0 : index
    %c0_18 = arith.constant 0 : index
    %41 = vector.load %arg14[%c0_17, %c0_18] : memref<1x8xf32, #tpu.memory_space<vmem>>, vector<1x8xf32>
    %42 = vector.broadcast %41 : vector<1x8xf32> to vector<128x8xf32>
    %43 = arith.addf %40, %42 : vector<128x8xf32>
    %44 = vector.extract_strided_slice %33 {offsets = [0, 0, 0], sizes = [10, 16, 4], strides = [1, 1, 1]} : vector<10x18x4xf32> to vector<10x16x4xf32>
    %45 = vector.extract_strided_slice %33 {offsets = [0, 1, 0], sizes = [10, 16, 4], strides = [1, 1, 1]} : vector<10x18x4xf32> to vector<10x16x4xf32>
    %46 = vector.extract_strided_slice %33 {offsets = [0, 2, 0], sizes = [10, 16, 4], strides = [1, 1, 1]} : vector<10x18x4xf32> to vector<10x16x4xf32>
    %47 = tpu.concatenate %44, %45, %46 in 2 : vector<10x16x4xf32>, vector<10x16x4xf32>, vector<10x16x4xf32> -> vector<10x16x12xf32>
    %48 = arith.truncf %47 : vector<10x16x12xf32> to vector<10x16x12xbf16>
    %49 = vector.extract_strided_slice %48 {offsets = [0, 0, 0], sizes = [8, 16, 12], strides = [1, 1, 1]} : vector<10x16x12xbf16> to vector<8x16x12xbf16>
    %50 = vector.shape_cast %49 : vector<8x16x12xbf16> to vector<128x12xbf16>
    %c0_19 = arith.constant 0 : index
    %c0_20 = arith.constant 0 : index
    %c0_21 = arith.constant 0 : index
    %51 = vector.load %arg6[%c0_19, %c0_20, %c0_21] : memref<3x12x4xbf16, #tpu.memory_space<vmem>>, vector<1x12x4xbf16>
    %52 = vector.shape_cast %51 : vector<1x12x4xbf16> to vector<12x4xbf16>
    %cst_22 = arith.constant dense<0.000000e+00> : vector<128x4xf32>
    %53 = tpu.matmul %50, %52, %cst_22 {dimension_numbers = #tpu.dot_dimension_numbers<[1], [0], [0], [1], [0, 0, 1, 1], [], []>} : vector<128x12xbf16>, vector<12x4xbf16>, vector<128x4xf32> -> vector<128x4xf32>
    %54 = vector.extract_strided_slice %48 {offsets = [1, 0, 0], sizes = [8, 16, 12], strides = [1, 1, 1]} : vector<10x16x12xbf16> to vector<8x16x12xbf16>
    %55 = vector.shape_cast %54 : vector<8x16x12xbf16> to vector<128x12xbf16>
    %c1 = arith.constant 1 : index
    %c0_23 = arith.constant 0 : index
    %c0_24 = arith.constant 0 : index
    %56 = vector.load %arg6[%c1, %c0_23, %c0_24] : memref<3x12x4xbf16, #tpu.memory_space<vmem>>, vector<1x12x4xbf16>
    %57 = vector.shape_cast %56 : vector<1x12x4xbf16> to vector<12x4xbf16>
    %cst_25 = arith.constant dense<0.000000e+00> : vector<128x4xf32>
    %58 = tpu.matmul %55, %57, %cst_25 {dimension_numbers = #tpu.dot_dimension_numbers<[1], [0], [0], [1], [0, 0, 1, 1], [], []>} : vector<128x12xbf16>, vector<12x4xbf16>, vector<128x4xf32> -> vector<128x4xf32>
    %59 = arith.addf %53, %58 : vector<128x4xf32>
    %60 = vector.extract_strided_slice %48 {offsets = [2, 0, 0], sizes = [8, 16, 12], strides = [1, 1, 1]} : vector<10x16x12xbf16> to vector<8x16x12xbf16>
    %61 = vector.shape_cast %60 : vector<8x16x12xbf16> to vector<128x12xbf16>
    %c2 = arith.constant 2 : index
    %c0_26 = arith.constant 0 : index
    %c0_27 = arith.constant 0 : index
    %62 = vector.load %arg6[%c2, %c0_26, %c0_27] : memref<3x12x4xbf16, #tpu.memory_space<vmem>>, vector<1x12x4xbf16>
    %63 = vector.shape_cast %62 : vector<1x12x4xbf16> to vector<12x4xbf16>
    %cst_28 = arith.constant dense<0.000000e+00> : vector<128x4xf32>
    %64 = tpu.matmul %61, %63, %cst_28 {dimension_numbers = #tpu.dot_dimension_numbers<[1], [0], [0], [1], [0, 0, 1, 1], [], []>} : vector<128x12xbf16>, vector<12x4xbf16>, vector<128x4xf32> -> vector<128x4xf32>
    %65 = arith.addf %59, %64 : vector<128x4xf32>
    %c0_29 = arith.constant 0 : index
    %c0_30 = arith.constant 0 : index
    %66 = vector.load %arg7[%c0_29, %c0_30] : memref<1x4xf32, #tpu.memory_space<vmem>>, vector<1x4xf32>
    %67 = vector.broadcast %66 : vector<1x4xf32> to vector<128x4xf32>
    %68 = arith.mulf %65, %67 : vector<128x4xf32>
    %c0_31 = arith.constant 0 : index
    %c0_32 = arith.constant 0 : index
    %69 = vector.load %arg8[%c0_31, %c0_32] : memref<1x4xf32, #tpu.memory_space<vmem>>, vector<1x4xf32>
    %70 = vector.broadcast %69 : vector<1x4xf32> to vector<128x4xf32>
    %71 = arith.addf %68, %70 : vector<128x4xf32>
    %cst_33 = arith.constant 0.000000e+00 : f32
    %72 = vector.broadcast %cst_33 : f32 to vector<128x4xf32>
    %73 = arith.maximumf %71, %72 : vector<128x4xf32>
    %74 = arith.truncf %73 : vector<128x4xf32> to vector<128x4xbf16>
    %c0_34 = arith.constant 0 : index
    %c0_35 = arith.constant 0 : index
    %75 = vector.load %arg9[%c0_34, %c0_35] : memref<4x8xbf16, #tpu.memory_space<vmem>>, vector<4x8xbf16>
    %cst_36 = arith.constant dense<0.000000e+00> : vector<128x8xf32>
    %76 = tpu.matmul %74, %75, %cst_36 {dimension_numbers = #tpu.dot_dimension_numbers<[1], [0], [0], [1], [0, 0, 1, 1], [], []>} : vector<128x4xbf16>, vector<4x8xbf16>, vector<128x8xf32> -> vector<128x8xf32>
    %c0_37 = arith.constant 0 : index
    %c0_38 = arith.constant 0 : index
    %77 = vector.load %arg10[%c0_37, %c0_38] : memref<1x8xf32, #tpu.memory_space<vmem>>, vector<1x8xf32>
    %78 = vector.broadcast %77 : vector<1x8xf32> to vector<128x8xf32>
    %79 = arith.mulf %76, %78 : vector<128x8xf32>
    %c0_39 = arith.constant 0 : index
    %c0_40 = arith.constant 0 : index
    %80 = vector.load %arg11[%c0_39, %c0_40] : memref<1x8xf32, #tpu.memory_space<vmem>>, vector<1x8xf32>
    %81 = vector.broadcast %80 : vector<1x8xf32> to vector<128x8xf32>
    %82 = arith.addf %79, %81 : vector<128x8xf32>
    %83 = arith.addf %82, %43 : vector<128x8xf32>
    %cst_41 = arith.constant 0.000000e+00 : f32
    %84 = vector.broadcast %cst_41 : f32 to vector<128x8xf32>
    %85 = arith.maximumf %83, %84 : vector<128x8xf32>
    %86 = vector.shape_cast %85 : vector<128x8xf32> to vector<1x8x16x8xf32>
    %c0_42 = arith.constant 0 : index
    %c0_43 = arith.constant 0 : index
    %c0_44 = arith.constant 0 : index
    %c0_45 = arith.constant 0 : index
    %87 = vector.load %arg15[%c0_42, %c0_43, %c0_44, %c0_45] : memref<1x8x16x8xf32, #tpu.memory_space<vmem>>, vector<1x8x16x8xf32>
    tpu.vector_store %arg15[%c0_42, %c0_43, %c0_44, %c0_45], %86 {strides = array<i32>} : memref<1x8x16x8xf32, #tpu.memory_space<vmem>>, vector<1x8x16x8xf32>,
    return
  }
  func.func @transform_0(%arg0: i32, %arg1: i32) -> (i32, i32, i32, i32) {
    %c0_i32 = arith.constant 0 : i32
    %c0_i32_0 = arith.constant 0 : i32
    %c0_i32_1 = arith.constant 0 : i32
    %c0_i32_2 = arith.constant 0 : i32
    return %arg0, %c0_i32, %c0_i32_0, %c0_i32_1 : i32, i32, i32, i32
  }
  func.func @transform_1(%arg0: i32, %arg1: i32) -> (i32, i32) {
    %c0_i32 = arith.constant 0 : i32
    %c0_i32_0 = arith.constant 0 : i32
    %c0_i32_1 = arith.constant 0 : i32
    return %c0_i32, %c0_i32_0 : i32, i32
  }
  func.func @transform_2(%arg0: i32, %arg1: i32) -> (i32, i32) {
    %c0_i32 = arith.constant 0 : i32
    %c0_i32_0 = arith.constant 0 : i32
    %c0_i32_1 = arith.constant 0 : i32
    return %c0_i32, %c0_i32_0 : i32, i32
  }
  func.func @transform_3(%arg0: i32, %arg1: i32) -> (i32, i32) {
    %c0_i32 = arith.constant 0 : i32
    %c0_i32_0 = arith.constant 0 : i32
    %c0_i32_1 = arith.constant 0 : i32
    return %c0_i32, %c0_i32_0 : i32, i32
  }
  func.func @transform_4(%arg0: i32, %arg1: i32) -> (i32, i32, i32) {
    %c0_i32 = arith.constant 0 : i32
    %c0_i32_0 = arith.constant 0 : i32
    %c0_i32_1 = arith.constant 0 : i32
    %c0_i32_2 = arith.constant 0 : i32
    return %c0_i32, %c0_i32_0, %c0_i32_1 : i32, i32, i32
  }
  func.func @transform_5(%arg0: i32, %arg1: i32) -> (i32, i32) {
    %c0_i32 = arith.constant 0 : i32
    %c0_i32_0 = arith.constant 0 : i32
    %c0_i32_1 = arith.constant 0 : i32
    return %c0_i32, %c0_i32_0 : i32, i32
  }
  func.func @transform_6(%arg0: i32, %arg1: i32) -> (i32, i32) {
    %c0_i32 = arith.constant 0 : i32
    %c0_i32_0 = arith.constant 0 : i32
    %c0_i32_1 = arith.constant 0 : i32
    return %c0_i32, %c0_i32_0 : i32, i32
  }
  func.func @transform_7(%arg0: i32, %arg1: i32) -> (i32, i32) {
    %c0_i32 = arith.constant 0 : i32
    %c0_i32_0 = arith.constant 0 : i32
    %c0_i32_1 = arith.constant 0 : i32
    return %c0_i32, %c0_i32_0 : i32, i32
  }
  func.func @transform_8(%arg0: i32, %arg1: i32) -> (i32, i32) {
    %c0_i32 = arith.constant 0 : i32
    %c0_i32_0 = arith.constant 0 : i32
    %c0_i32_1 = arith.constant 0 : i32
    return %c0_i32, %c0_i32_0 : i32, i32
  }
  func.func @transform_9(%arg0: i32, %arg1: i32) -> (i32, i32) {
    %c0_i32 = arith.constant 0 : i32
    %c0_i32_0 = arith.constant 0 : i32
    %c0_i32_1 = arith.constant 0 : i32
    return %c0_i32, %c0_i32_0 : i32, i32
  }
  func.func @transform_10(%arg0: i32, %arg1: i32) -> (i32, i32) {
    %c0_i32 = arith.constant 0 : i32
    %c0_i32_0 = arith.constant 0 : i32
    %c0_i32_1 = arith.constant 0 : i32
    return %c0_i32, %c0_i32_0 : i32, i32
  }
  func.func @transform_11(%arg0: i32, %arg1: i32) -> (i32, i32) {
    %c0_i32 = arith.constant 0 : i32
    %c0_i32_0 = arith.constant 0 : i32
    %c0_i32_1 = arith.constant 0 : i32
    return %c0_i32, %c0_i32_0 : i32, i32
  }
  func.func @transform_12(%arg0: i32, %arg1: i32) -> (i32, i32) {
    %c0_i32 = arith.constant 0 : i32
    %c0_i32_0 = arith.constant 0 : i32
    %c0_i32_1 = arith.constant 0 : i32
    return %c0_i32, %c0_i32_0 : i32, i32
  }
  func.func @transform_13(%arg0: i32, %arg1: i32) -> (i32, i32, i32, i32) {
    %c0_i32 = arith.constant 0 : i32
    %c0_i32_0 = arith.constant 0 : i32
    %c0_i32_1 = arith.constant 0 : i32
    return %arg0, %arg1, %c0_i32, %c0_i32_0 : i32, i32, i32, i32
  }
}

</mosaic_0001>

<bundles_post_ra>
// kernel: tpu_custom_call.1
= control target key start
LH: loop header
LB: loop body
LE: loop exit
PB: predicated region body
PF: predicated region fallthrough
CT: control target
= control target key end

     0   :  { %s3166_s25 = smov 0   ;;  %s3168_s26 = smov 0   ;;  %s4411_s0 = inlined_call_operand.vmem [shape: bf16[2,18,18,8], index: 0, kind: input, shape index: {}]   ;;  %s4412_s1 = inlined_call_operand.vmem [shape: bf16[8,4], index: 1, kind: input, shape index: {}]   ;;  %s4413_s2 = inlined_call_operand.vmem [shape: f32[1,4], index: 2, kind: input, shape index: {}]   ;;  %s4414_s3 = inlined_call_operand.vmem [shape: f32[1,4], index: 3, kind: input, shape index: {}]   ;;  %s4415_s4 = inlined_call_operand.vmem [shape: bf16[3,12,4], index: 4, kind: input, shape index: {}]   ;;  %s4416_s5 = inlined_call_operand.vmem [shape: f32[1,4], index: 5, kind: input, shape index: {}]   ;;  %s4417_s6 = inlined_call_operand.vmem [shape: f32[1,4], index: 6, kind: input, shape index: {}]   ;;  %s4418_s7 = inlined_call_operand.vmem [shape: bf16[4,8], index: 7, kind: input, shape index: {}]   ;;  %s4419_s8 = inlined_call_operand.vmem [shape: f32[1,8], index: 8, kind: input, shape index: {}]   ;;  %s4420_s9 = inlined_call_operand.vmem [shape: f32[1,8], index: 9, kind: input, shape index: {}]   ;;  %s4421_s10 = inlined_call_operand.vmem [shape: bf16[8,8], index: 10, kind: input, shape index: {}]   ;;  %s4422_s11 = inlined_call_operand.vmem [shape: f32[1,8], index: 11, kind: input, shape index: {}]   ;;  %s4423_s12 = inlined_call_operand.vmem [shape: f32[1,8], index: 12, kind: input, shape index: {}]   ;;  %s4424_s13 = inlined_call_operand.vmem [shape: f32[2,16,16,8], index: 13, kind: output, shape index: {}]  }
   0x1   :  { %s3170_s27 = smov 0   ;;  %s3172_s28 = smov 0  }
   0x2   :  { %s3174_s29 = smov 0  }
   0x3 LB: > { %s32_s30 = sadd.s32 1, %s3084_s27  ;;  %s35_s14 = sadd.s32 1, %s3088_s28  ;;  %s3092_s29 = sphi %s3174_s29, %s23_s29   ;;  %s3088_s28 = sphi %s3172_s28, %s4478_s28   ;;  %s3084_s27 = sphi %s3170_s27, %s4477_s27   ;;  %s3080_s26 = sphi %s3168_s26, %s4476_s26   ;;  %s3076_s25 = sphi %s3166_s25, %s4475_s25  }
   0x4   : > { %p33_p0 = scmp.ge.s32.totalorder %s32_s30, 2  ;;  %p2793_p1 = scmp.ge.s32.totalorder %s3092_s29, 1 }
   0x5   : > { %p401_p2 = scmp.lt.s32.totalorder %s3092_s29, 5 }
   0x6   : > { %s4480_s30 = smov (%p33_p0, %s32_s30), 0  ;;  %s4482_s14 = smov (!%p33_p0, %s35_s14), %s3088_s28 }
   0x7   : > { %p402_p3 = pnand %p2793_p1, %p401_p2  ;;  %p37_p4 = scmp.ge.s32.totalorder %s4482_s14, 2 }
   0x8   : > { %p450_p5 = scmp.lt.s32.totalorder (!%p402_p3), %s3080_s26, 1  ;;  %s2872_s17 = smul.u32 (!%p402_p3), 96, %s3076_s25 }
   0x9   : > { %s4484_s14 = smov (%p37_p4, %s4482_s14), 0  ;;  %405 = sbr.rel (%p402_p3) target bundleno = 908 (0x38c), region = 72 }
   0xe   : > { %v835_v0 = vld [vmem:[%s4412_s1] sm:$0xf]  ;;  %vm1030_vm0 = vcmask 1043456   ;;  %s4486_s26 = smov (!%p450_p5, %s3080_s26), 1  ;;  %vm561_vm1 = vcmask 1040384   ;;  %vm565_vm2 = vcmask 1041409  }
   0xf   : > { %v1032_v1 = vsel %vm1030_vm0, %v835_v0, 0  ;;  %s2879_s18 = smul.u32 216, %s4486_s26  ;;  %vm569_vm3 = vcmask 1042434   ;;  %vm573_vm4 = vcmask 1043459   ;;  %vm1005_vm5 = vcmask 64512   ;;  %s2797_s24 = sshll.u32 %s4486_s26, 5 }
  0x10   : > { %1041 = vmatpush.bf16.msra.mxu0 %v1032_v1 }
  0x11   : > { %s454_s21 = scalar_lea.vmem %s4411_s0, %s2879_s18  ;;  %s3095_s18 = smov 8  }
  0x12   : > { %s3209_s22 = scalar_lea.vmem %s454_s21, %s2872_s17  ;;  %s3422_s17 = sshll.u32 %s3076_s25, 3 }
  0x13   : > { %v471_v2 = vld [vmem:[%s3209_s22] sm:$0xf]  ;;  %v472_v3 = vld [vmem:[%s3209_s22 + $0x4] sm:$0xf]  ;;  %v474_v20 = vld [vmem:[%s3209_s22 + $0xc] sm:$0xf] }
  0x14   : > { %v531_v4 = vrot.slane %v471_v2, 3  ;;  %v532_v5 = vrot.slane %v472_v3, 3  ;;  %v473_v21 = vld [vmem:[%s3209_s22 + $0x8] sm:$0x1]  ;;  %v534_v22 = vrot.slane %v474_v20, 3  ;;  %s3094_s25 = smov 4  }
  0x15   : > { %v475_v23 = vld [vmem:[%s3209_s22 + $0x10] sm:$0xf]  ;;  %v533_v24 = vrot.slane %v473_v21, 3  ;;  %v477_v40 = vld [vmem:[%s3209_s22 + $0x18] sm:$0xf]  ;;  %p458_p6 = scmp.lt.s32.totalorder %s3422_s17, 15 }
  0x16   : > { %v564_v6 = vsel %vm561_vm1, %v471_v2, %v531_v4  ;;  %v566_v7 = vsel %vm565_vm2, %v471_v2, %v531_v4  ;;  %v570_v8 = vsel %vm569_vm3, %v471_v2, %v531_v4  ;;  %v574_v9 = vsel %vm573_vm4, %v471_v2, %v531_v4  ;;  %v476_v41 = vld [vmem:[%s3209_s22 + $0x14] sm:$0x1]  ;;  %v478_v43 = vld [vmem:[%s3209_s22 + $0x1c] sm:$0xf]  ;;  %v480_v60 = vld [vmem:[%s3209_s22 + $0x24] sm:$0xf] }
  0x17   : > { %v568_v10 = vrot.slane %v566_v7, 1  ;;  %v572_v11 = vrot.slane %v570_v8, 2  ;;  %v576_v12 = vrot.slane %v574_v9, 3  ;;  %v579_v13 = vsel %vm561_vm1, %v472_v3, %v532_v5  ;;  %836 = vst [vmem:[#allocation1] ss:$9 sm:$0xff] %v564_v6 }
  0x18   : > { %v580_v14 = vsel %vm565_vm2, %v472_v3, %v532_v5  ;;  %v583_v15 = vsel %vm569_vm3, %v472_v3, %v532_v5  ;;  %v586_v16 = vsel %vm573_vm4, %v472_v3, %v532_v5  ;;  %847 = vst [vmem:[#allocation1 + $0x4] ss:$9 sm:$0xff] %v579_v13  ;;  %v535_v25 = vrot.slane %v475_v23, 3  ;;  %v479_v61 = vld [vmem:[%s3209_s22 + $0x20] sm:$0x1] }
  0x19   : > { %v582_v17 = vrot.slane %v580_v14, 1  ;;  %v585_v18 = vrot.slane %v583_v15, 2  ;;  %839 = vst [vmem:[#allocation1 + $0x1] ss:$9 sm:$0xff] %v568_v10  ;;  %v588_v19 = vrot.slane %v586_v16, 3  ;;  %v595_v26 = vsel %vm565_vm2, %v474_v20, %v534_v22 }
  0x1a   : > { %842 = vst [vmem:[#allocation1 + $0x2] ss:$9 sm:$0xff] %v572_v11  ;;  %v598_v27 = vsel %vm569_vm3, %v474_v20, %v534_v22  ;;  %v591_v28 = vsel %vm561_vm1, %v473_v21, %v533_v24  ;;  %v601_v29 = vsel %vm573_vm4, %v474_v20, %v534_v22  ;;  %v594_v30 = vsel %vm561_vm1, %v474_v20, %v534_v22  ;;  %v481_v3 = vld [vmem:[%s3209_s22 + $0x28] sm:$0xf]  ;;  %v483_v16 = vld [vmem:[%s3209_s22 + $0x30] sm:$0xf] }
  0x1b   : > { %845 = vst [vmem:[#allocation1 + $0x3] ss:$9 sm:$0xff] %v576_v12  ;;  %v597_v31 = vrot.slane %v595_v26, 1  ;;  %v600_v33 = vrot.slane %v598_v27, 2  ;;  %v607_v34 = vsel %vm565_vm2, %v475_v23, %v535_v25  ;;  %v603_v35 = vrot.slane %v601_v29, 3 }
  0x1c   : > { %850 = vst [vmem:[#allocation1 + $0x5] ss:$9 sm:$0xff] %v582_v17  ;;  %v610_v36 = vsel %vm569_vm3, %v475_v23, %v535_v25  ;;  %v606_v37 = vsel %vm561_vm1, %v475_v23, %v535_v25  ;;  %v609_v38 = vrot.slane %v607_v34, 1  ;;  %v537_v42 = vrot.slane %v477_v40, 3  ;;  %v482_v17 = vld [vmem:[%s3209_s22 + $0x2c] sm:$0x1] }
  0x1d   : > { %853 = vst [vmem:[#allocation1 + $0x6] ss:$9 sm:$0xff] %v585_v18  ;;  %v612_v39 = vrot.slane %v610_v36, 2  ;;  %v613_v44 = vsel %vm573_vm4, %v475_v23, %v535_v25  ;;  %v536_v45 = vrot.slane %v476_v41, 3  ;;  %v538_v46 = vrot.slane %v478_v43, 3 }
  0x1e   : > { %856 = vst [vmem:[#allocation1 + $0x7] ss:$9 sm:$0xff] %v588_v19  ;;  %v615_v47 = vrot.slane %v613_v44, 3  ;;  %v622_v48 = vsel %vm565_vm2, %v477_v40, %v537_v42  ;;  %v625_v49 = vsel %vm569_vm3, %v477_v40, %v537_v42  ;;  %v628_v51 = vsel %vm573_vm4, %v477_v40, %v537_v42  ;;  %v484_v34 = vld [vmem:[%s3209_s22 + $0x34] sm:$0xf] }
  0x1f   : > { %v618_v50 = vsel %vm561_vm1, %v476_v41, %v536_v45  ;;  %v621_v53 = vsel %vm561_vm1, %v477_v40, %v537_v42  ;;  %v624_v54 = vrot.slane %v622_v48, 1  ;;  %v627_v55 = vrot.slane %v625_v49, 2 }
  0x20   : > { %v634_v56 = vsel %vm565_vm2, %v478_v43, %v538_v46  ;;  %v630_v57 = vrot.slane %v628_v51, 3  ;;  %v633_v58 = vsel %vm561_vm1, %v478_v43, %v538_v46  ;;  %v540_v62 = vrot.slane %v480_v60, 3 }
  0x21   : > { %v636_v59 = vrot.slane %v634_v56, 1  ;;  %v637_v63 = vsel %vm569_vm3, %v478_v43, %v538_v46  ;;  %v640_v0 = vsel %vm573_vm4, %v478_v43, %v538_v46  ;;  %v539_v1 = vrot.slane %v479_v61, 3 }
  0x22   : > { %v639_v2 = vrot.slane %v637_v63, 2  ;;  %v642_v4 = vrot.slane %v640_v0, 3  ;;  %v649_v5 = vsel %vm565_vm2, %v480_v60, %v540_v62  ;;  %v652_v6 = vsel %vm569_vm3, %v480_v60, %v540_v62 }
  0x23   : > { %v645_v8 = vsel %vm561_vm1, %v479_v61, %v539_v1  ;;  %v655_v9 = vsel %vm573_vm4, %v480_v60, %v540_v62  ;;  %v541_v10 = vrot.slane %v481_v3, 3  ;;  %v648_v11 = vsel %vm561_vm1, %v480_v60, %v540_v62 }
  0x24   : > { %v651_v12 = vrot.slane %v649_v5, 1  ;;  %v654_v13 = vrot.slane %v652_v6, 2  ;;  %v657_v14 = vrot.slane %v655_v9, 3  ;;  %v543_v19 = vrot.slane %v483_v16, 3 }
  0x25   : > { %v857_v32 = vld [vmem:[#allocation1] sm:$0xff]  ;;  %v660_v15 = vsel %vm561_vm1, %v481_v3, %v541_v10  ;;  %v661_v18 = vsel %vm565_vm2, %v481_v3, %v541_v10  ;;  %v664_v20 = vsel %vm569_vm3, %v481_v3, %v541_v10  ;;  %v667_v21 = vsel %vm573_vm4, %v481_v3, %v541_v10 }
  0x26   : > { %2802 = vmatmul.msk.bf16.vlgmr.msra.gmra.mxu0 %vm1005_vm5, %v857_v32  ;;  %858 = vst [vmem:[#allocation1] ss:$9 sm:$0xff] %v591_v28  ;;  %v542_v22 = vrot.slane %v482_v17, 3  ;;  %v663_v23 = vrot.slane %v661_v18, 1  ;;  %v666_v24 = vrot.slane %v664_v20, 2  ;;  %v669_v25 = vrot.slane %v667_v21, 3 }
  0x27   : > { %859 = vst [vmem:[#allocation1 + $0x1] ss:$9 sm:$0xff] %v594_v30  ;;  %v676_v26 = vsel %vm565_vm2, %v483_v16, %v543_v19  ;;  %v679_v28 = vsel %vm569_vm3, %v483_v16, %v543_v19  ;;  %v682_v30 = vsel %vm573_vm4, %v483_v16, %v543_v19  ;;  %v544_v36 = vrot.slane %v484_v34, 3  ;;  %v492_v18 = vld [vmem:[%s3209_s22 + $0x54] sm:$0xf] }
  0x28   : > { %861 = vst [vmem:[#allocation1 + $0x2] ss:$9 sm:$0xff] %v597_v31  ;;  %v672_v29 = vsel %vm561_vm1, %v482_v17, %v542_v22  ;;  %v675_v31 = vsel %vm561_vm1, %v483_v16, %v543_v19  ;;  %v678_v32 = vrot.slane %v676_v26, 1  ;;  %v552_v26 = vrot.slane %v492_v18, 3 }
  0x29   : > { %863 = vst [vmem:[#allocation1 + $0x3] ss:$9 sm:$0xff] %v600_v33  ;;  %v681_v33 = vrot.slane %v679_v28, 2  ;;  %v691_v41 = vsel %vm569_vm3, %v484_v34, %v544_v36  ;;  %v694_v42 = vsel %vm573_vm4, %v484_v34, %v544_v36  ;;  %v687_v44 = vsel %vm561_vm1, %v484_v34, %v544_v36 }
  0x2a   : > { %865 = vst [vmem:[#allocation1 + $0x4] ss:$9 sm:$0xff] %v603_v35  ;;  %v684_v35 = vrot.slane %v682_v30, 3  ;;  %v693_v46 = vrot.slane %v691_v41, 2  ;;  %v696_v48 = vrot.slane %v694_v42, 3  ;;  %v756_v30 = vsel %vm561_vm1, %v492_v18, %v552_v26 }
  0x2b   : > { %866 = vst [vmem:[#allocation1 + $0x5] ss:$9 sm:$0xff] %v606_v37  ;;  %v486_v37 = vld [vmem:[%s3209_s22 + $0x3c] sm:$0xf] }
  0x2c   : > { %868 = vst [vmem:[#allocation1 + $0x6] ss:$9 sm:$0xff] %v609_v38  ;;  %v485_v38 = vld [vmem:[%s3209_s22 + $0x38] sm:$0x1]  ;;  %v546_v40 = vrot.slane %v486_v37, 3 }
  0x2d   : > { %870 = vst [vmem:[#allocation1 + $0x7] ss:$9 sm:$0xff] %v612_v39  ;;  %v688_v39 = vsel %vm565_vm2, %v484_v34, %v544_v36  ;;  %v545_v43 = vrot.slane %v485_v38, 3  ;;  %v760_v34 = vsel %vm569_vm3, %v492_v18, %v552_v26 }
  0x2e   : > { %v690_v45 = vrot.slane %v688_v39, 1  ;;  %v703_v49 = vsel %vm565_vm2, %v486_v37, %v546_v40 }
  0x2f   : > { %v699_v51 = vsel %vm561_vm1, %v485_v38, %v545_v43  ;;  %v762_v38 = vrot.slane %v760_v34, 2 }
  0x34   : > { %v871_v52 = vld [vmem:[#allocation1] sm:$0xff] }
  0x35   : > { %873 = vst [vmem:[#allocation1] ss:$9 sm:$0xff] %v615_v47 }
  0x36   : > { %2803 = vmatmul.msk.bf16.gmra.mxu0 %vm1005_vm5, %v871_v52  ;;  %874 = vst [vmem:[#allocation1 + $0x1] ss:$9 sm:$0xff] %v618_v50  ;;  %v706_v50 = vsel %vm569_vm3, %v486_v37, %v546_v40  ;;  %v702_v52 = vsel %vm561_vm1, %v486_v37, %v546_v40 }
  0x37   : > { %875 = vst [vmem:[#allocation1 + $0x2] ss:$9 sm:$0xff] %v621_v53  ;;  %v705_v53 = vrot.slane %v703_v49, 1  ;;  %v495_v49 = vld [vmem:[%s3209_s22 + $0x60] sm:$0xf] }
  0x38   : > { %877 = vst [vmem:[#allocation1 + $0x3] ss:$9 sm:$0xff] %v624_v54  ;;  %v708_v54 = vrot.slane %v706_v50, 2 }
  0x39   : > { %879 = vst [vmem:[#allocation1 + $0x4] ss:$9 sm:$0xff] %v627_v55  ;;  %v487_v55 = vld [vmem:[%s3209_s22 + $0x40] sm:$0xf] }
  0x3a   : > { %881 = vst [vmem:[#allocation1 + $0x5] ss:$9 sm:$0xff] %v630_v57  ;;  %v547_v56 = vrot.slane %v487_v55, 3  ;;  %v489_v57 = vld [vmem:[%s3209_s22 + $0x48] sm:$0xf] }
  0x3b   : > { %882 = vst [vmem:[#allocation1 + $0x6] ss:$9 sm:$0xff] %v633_v58  ;;  %v709_v58 = vsel %vm573_vm4, %v486_v37, %v546_v40  ;;  %v549_v61 = vrot.slane %v489_v57, 3  ;;  %v494_v37 = vld [vmem:[%s3209_s22 + $0x5c] sm:$0x1] }
  0x3c   : > { %884 = vst [vmem:[#allocation1 + $0x7] ss:$9 sm:$0xff] %v636_v59  ;;  %v488_v59 = vld [vmem:[%s3209_s22 + $0x44] sm:$0x1]  ;;  %v715_v60 = vsel %vm565_vm2, %v487_v55, %v547_v56  ;;  %v711_v62 = vrot.slane %v709_v58, 3  ;;  %v718_v63 = vsel %vm569_vm3, %v487_v55, %v547_v56  ;;  %v721_v0 = vsel %vm573_vm4, %v487_v55, %v547_v56 }
  0x3d   : > { %v548_v1 = vrot.slane %v488_v59, 3  ;;  %v717_v3 = vrot.slane %v715_v60, 1  ;;  %v720_v5 = vrot.slane %v718_v63, 2  ;;  %v723_v6 = vrot.slane %v721_v0, 3 }
  0x3e   : > { %v729_v9 = vsel %vm561_vm1, %v489_v57, %v549_v61 }
  0x43   : > { %v885_v7 = vld [vmem:[#allocation1] sm:$0xff] }
  0x44   : > { %887 = vst [vmem:[#allocation1] ss:$9 sm:$0xff] %v639_v2  ;;  %v714_v2 = vsel %vm561_vm1, %v487_v55, %v547_v56 }
  0x45   : > { %889 = vst [vmem:[#allocation1 + $0x1] ss:$9 sm:$0xff] %v642_v4 }
  0x46   : > { %2804 = vmatmul.msk.bf16.gmra.mxu0 %vm1005_vm5, %v885_v7  ;;  %890 = vst [vmem:[#allocation1 + $0x2] ss:$9 sm:$0xff] %v645_v8  ;;  %v730_v7 = vsel %vm565_vm2, %v489_v57, %v549_v61  ;;  %v726_v8 = vsel %vm561_vm1, %v488_v59, %v548_v1 }
  0x47   : > { %891 = vst [vmem:[#allocation1 + $0x3] ss:$9 sm:$0xff] %v648_v11  ;;  %v732_v10 = vrot.slane %v730_v7, 1  ;;  %v490_v11 = vld [vmem:[%s3209_s22 + $0x4c] sm:$0xf] }
  0x48   : > { %893 = vst [vmem:[#allocation1 + $0x4] ss:$9 sm:$0xff] %v651_v12  ;;  %v550_v12 = vrot.slane %v490_v11, 3  ;;  %v497_v7 = vld [vmem:[%s3209_s22 + $0x68] sm:$0x1] }
  0x49   : > { %895 = vst [vmem:[#allocation1 + $0x5] ss:$9 sm:$0xff] %v654_v13  ;;  %v733_v13 = vsel %vm569_vm3, %v489_v57, %v549_v61 }
  0x4a   : > { %897 = vst [vmem:[#allocation1 + $0x6] ss:$9 sm:$0xff] %v657_v14  ;;  %v736_v14 = vsel %vm573_vm4, %v489_v57, %v549_v61  ;;  %v735_v16 = vrot.slane %v733_v13, 2  ;;  %v742_v17 = vsel %vm565_vm2, %v490_v11, %v550_v12  ;;  %v745_v20 = vsel %vm569_vm3, %v490_v11, %v550_v12 }
  0x4b   : > { %898 = vst [vmem:[#allocation1 + $0x7] ss:$9 sm:$0xff] %v660_v15  ;;  %v491_v15 = vld [vmem:[%s3209_s22 + $0x50] sm:$0x1]  ;;  %v738_v19 = vrot.slane %v736_v14, 3  ;;  %v748_v21 = vsel %vm573_vm4, %v490_v11, %v550_v12 }
  0x4c   : > { %v750_v28 = vrot.slane %v748_v21, 3 }
  0x52   : > { %v899_v27 = vld [vmem:[#allocation1] sm:$0xff] }
  0x53   : > { %901 = vst [vmem:[#allocation1] ss:$9 sm:$0xff] %v663_v23  ;;  %v551_v23 = vrot.slane %v491_v15, 3 }
  0x54   : > { %903 = vst [vmem:[#allocation1 + $0x1] ss:$9 sm:$0xff] %v666_v24  ;;  %v741_v24 = vsel %vm561_vm1, %v490_v11, %v550_v12 }
  0x55   : > { %905 = vst [vmem:[#allocation1 + $0x2] ss:$9 sm:$0xff] %v669_v25  ;;  %v744_v25 = vrot.slane %v742_v17, 1 }
  0x56   : > { %2805 = vmatmul.msk.bf16.gmra.mxu0 %vm1005_vm5, %v899_v27  ;;  %906 = vst [vmem:[#allocation1 + $0x3] ss:$9 sm:$0xff] %v672_v29  ;;  %v747_v27 = vrot.slane %v745_v20, 2  ;;  %v753_v29 = vsel %vm561_vm1, %v491_v15, %v551_v23 }
  0x57   : > { %907 = vst [vmem:[#allocation1 + $0x4] ss:$9 sm:$0xff] %v675_v31  ;;  %v493_v31 = vld [vmem:[%s3209_s22 + $0x58] sm:$0xf] }
  0x58   : > { %909 = vst [vmem:[#allocation1 + $0x5] ss:$9 sm:$0xff] %v678_v32  ;;  %v553_v32 = vrot.slane %v493_v31, 3 }
  0x59   : > { %911 = vst [vmem:[#allocation1 + $0x6] ss:$9 sm:$0xff] %v681_v33  ;;  %v757_v33 = vsel %vm565_vm2, %v492_v18, %v552_v26 }
  0x5a   : > { %913 = vst [vmem:[#allocation1 + $0x7] ss:$9 sm:$0xff] %v684_v35  ;;  %v763_v35 = vsel %vm573_vm4, %v492_v18, %v552_v26  ;;  %v759_v36 = vrot.slane %v757_v33, 1  ;;  %v769_v39 = vsel %vm565_vm2, %v493_v31, %v553_v32  ;;  %v772_v41 = vsel %vm569_vm3, %v493_v31, %v553_v32 }
  0x5b   : > { %v765_v40 = vrot.slane %v763_v35, 3  ;;  %v775_v43 = vsel %vm573_vm4, %v493_v31, %v553_v32 }
  0x61   : > { %v914_v47 = vld [vmem:[#allocation1] sm:$0xff] }
  0x62   : > { %915 = vst [vmem:[#allocation1] ss:$9 sm:$0xff] %v687_v44  ;;  %v554_v44 = vrot.slane %v494_v37, 3 }
  0x63   : > { %917 = vst [vmem:[#allocation1 + $0x1] ss:$9 sm:$0xff] %v690_v45  ;;  %v768_v45 = vsel %vm561_vm1, %v493_v31, %v553_v32  ;;  %v500_v31 = vld [vmem:[%s3209_s22 + $0x74] sm:$0x1] }
  0x64   : > { %919 = vst [vmem:[#allocation1 + $0x2] ss:$9 sm:$0xff] %v693_v46  ;;  %v771_v46 = vrot.slane %v769_v39, 1  ;;  %v780_v50 = vsel %vm561_vm1, %v494_v37, %v554_v44  ;;  %v560_v35 = vrot.slane %v500_v31, 3 }
  0x65   : > { %921 = vst [vmem:[#allocation1 + $0x3] ss:$9 sm:$0xff] %v696_v48  ;;  %v777_v48 = vrot.slane %v775_v43, 3 }
  0x66   : > { %2806 = vmatmul.msk.bf16.gmra.mxu0 %vm1005_vm5, %v914_v47  ;;  %922 = vst [vmem:[#allocation1 + $0x4] ss:$9 sm:$0xff] %v699_v51  ;;  %v774_v47 = vrot.slane %v772_v41, 2  ;;  %v555_v51 = vrot.slane %v495_v49, 3 }
  0x67   : > { %923 = vst [vmem:[#allocation1 + $0x5] ss:$9 sm:$0xff] %v702_v52  ;;  %v496_v52 = vld [vmem:[%s3209_s22 + $0x64] sm:$0xf] }
  0x68   : > { %925 = vst [vmem:[#allocation1 + $0x6] ss:$9 sm:$0xff] %v705_v53  ;;  %v556_v53 = vrot.slane %v496_v52, 3  ;;  %v787_v55 = vsel %vm569_vm3, %v495_v49, %v555_v51  ;;  %v790_v56 = vsel %vm573_vm4, %v495_v49, %v555_v51  ;;  %v783_v57 = vsel %vm561_vm1, %v495_v49, %v555_v51 }
  0x69   : > { %927 = vst [vmem:[#allocation1 + $0x7] ss:$9 sm:$0xff] %v708_v54  ;;  %v784_v54 = vsel %vm565_vm2, %v495_v49, %v555_v51  ;;  %v789_v59 = vrot.slane %v787_v55, 2 }
  0x6a   : > { %v786_v58 = vrot.slane %v784_v54, 1  ;;  %v796_v60 = vsel %vm565_vm2, %v496_v52, %v556_v53  ;;  %v799_v63 = vsel %vm569_vm3, %v496_v52, %v556_v53  ;;  %v802_v0 = vsel %vm573_vm4, %v496_v52, %v556_v53 }
  0x6b   : > { %v795_v1 = vsel %vm561_vm1, %v496_v52, %v556_v53 }
  0x70   : > { %v928_v4 = vld [vmem:[#allocation1] sm:$0xff] }
  0x71   : > { %930 = vst [vmem:[#allocation1] ss:$9 sm:$0xff] %v711_v62  ;;  %v792_v62 = vrot.slane %v790_v56, 3 }
  0x72   : > { %931 = vst [vmem:[#allocation1 + $0x1] ss:$9 sm:$0xff] %v714_v2  ;;  %v798_v2 = vrot.slane %v796_v60, 1 }
  0x73   : > { %933 = vst [vmem:[#allocation1 + $0x2] ss:$9 sm:$0xff] %v717_v3  ;;  %v801_v3 = vrot.slane %v799_v63, 2 }
  0x74   : > { %935 = vst [vmem:[#allocation1 + $0x3] ss:$9 sm:$0xff] %v720_v5  ;;  %v804_v5 = vrot.slane %v802_v0, 3 }
  0x75   : > { %937 = vst [vmem:[#allocation1 + $0x4] ss:$9 sm:$0xff] %v723_v6 }
  0x76   : > { %2807 = vmatmul.msk.bf16.gmra.mxu0 %vm1005_vm5, %v928_v4  ;;  %938 = vst [vmem:[#allocation1 + $0x5] ss:$9 sm:$0xff] %v726_v8  ;;  %v498_v4 = vld [vmem:[%s3209_s22 + $0x6c] sm:$0xf] }
  0x77   : > { %939 = vst [vmem:[#allocation1 + $0x6] ss:$9 sm:$0xff] %v729_v9  ;;  %v558_v8 = vrot.slane %v498_v4, 3  ;;  %v499_v9 = vld [vmem:[%s3209_s22 + $0x70] sm:$0xf] }
  0x78   : > { %941 = vst [vmem:[#allocation1 + $0x7] ss:$9 sm:$0xff] %v732_v10  ;;  %v557_v10 = vrot.slane %v497_v7, 3  ;;  %v559_v11 = vrot.slane %v499_v9, 3 }
  0x79   : > { %v811_v12 = vsel %vm565_vm2, %v498_v4, %v558_v8  ;;  %v814_v13 = vsel %vm569_vm3, %v498_v4, %v558_v8  ;;  %v817_v15 = vsel %vm573_vm4, %v498_v4, %v558_v8  ;;  %v810_v17 = vsel %vm561_vm1, %v498_v4, %v558_v8 }
  0x7a   : > { %v807_v14 = vsel %vm561_vm1, %v497_v7, %v557_v10  ;;  %v813_v18 = vrot.slane %v811_v12, 1  ;;  %v823_v20 = vsel %vm565_vm2, %v499_v9, %v559_v11  ;;  %v819_v23 = vrot.slane %v817_v15, 3 }
  0x7b   : > { %v822_v26 = vsel %vm561_vm1, %v499_v9, %v559_v11  ;;  %v829_v33 = vsel %vm573_vm4, %v499_v9, %v559_v11 }
  0x7c   : > { %v831_v37 = vrot.slane %v829_v33, 3 }
  0x7f   : > { %v942_v22 = vld [vmem:[#allocation1] sm:$0xff] }
  0x80   : > { %944 = vst [vmem:[#allocation1] ss:$9 sm:$0xff] %v735_v16 }
  0x81   : > { %946 = vst [vmem:[#allocation1 + $0x1] ss:$9 sm:$0xff] %v738_v19  ;;  %v816_v19 = vrot.slane %v814_v13, 2 }
  0x82   : > { %947 = vst [vmem:[#allocation1 + $0x2] ss:$9 sm:$0xff] %v741_v24  ;;  %v826_v24 = vsel %vm569_vm3, %v499_v9, %v559_v11 }
  0x83   : > { %949 = vst [vmem:[#allocation1 + $0x3] ss:$9 sm:$0xff] %v744_v25 }
  0x84   : > { %951 = vst [vmem:[#allocation1 + $0x4] ss:$9 sm:$0xff] %v747_v27  ;;  %v825_v27 = vrot.slane %v823_v20, 1 }
  0x85   : > { %953 = vst [vmem:[#allocation1 + $0x5] ss:$9 sm:$0xff] %v750_v28  ;;  %v828_v28 = vrot.slane %v826_v24, 2 }
  0x86   : > { %2808 = vmatmul.msk.bf16.gmra.mxu0 %vm1005_vm5, %v942_v22  ;;  %954 = vst [vmem:[#allocation1 + $0x6] ss:$9 sm:$0xff] %v753_v29  ;;  %v3338_v22 = vld [vmem:[%s4413_s2] ss:$0 sm:$0xff] }
  0x87   : > { %955 = vst [vmem:[#allocation1 + $0x7] ss:$9 sm:$0xff] %v756_v30  ;;  %v3346_v29 = vld [vmem:[%s4414_s3] ss:$0 sm:$0xff] }
  0x8e   : > { %v956_v42 = vld [vmem:[#allocation1] sm:$0xff] }
  0x8f   : > { %958 = vst [vmem:[#allocation1] ss:$9 sm:$0xff] %v759_v36 }
  0x90   : > { %960 = vst [vmem:[#allocation1 + $0x1] ss:$9 sm:$0xff] %v762_v38 }
  0x91   : > { %962 = vst [vmem:[#allocation1 + $0x2] ss:$9 sm:$0xff] %v765_v40  ;;  %v834_v40 = vsel %vm561_vm1, %v500_v31, %v560_v35  ;;  %vm1908_vm1 = vcmask 1046528  }
  0x92   : > { %963 = vst [vmem:[#allocation1 + $0x3] ss:$9 sm:$0xff] %v768_v45 }
  0x93   : > { %965 = vst [vmem:[#allocation1 + $0x4] ss:$9 sm:$0xff] %v771_v46 }
  0x94   : > { %967 = vst [vmem:[#allocation1 + $0x5] ss:$9 sm:$0xff] %v774_v47 }
  0x95   : > { %969 = vst [vmem:[#allocation1 + $0x6] ss:$9 sm:$0xff] %v777_v48 }
  0x96   : > { %2809 = vmatmul.msk.bf16.gmra.mxu0 %vm1005_vm5, %v956_v42  ;;  %970 = vst [vmem:[#allocation1 + $0x7] ss:$9 sm:$0xff] %v780_v50 }
  0x9d   : > { %v971_v61 = vld [vmem:[#allocation1] sm:$0xff] }
  0x9e   : > { %972 = vst [vmem:[#allocation1] ss:$9 sm:$0xff] %v783_v57 }
  0x9f   : > { %974 = vst [vmem:[#allocation1 + $0x1] ss:$9 sm:$0xff] %v786_v58 }
  0xa0   : > { %976 = vst [vmem:[#allocation1 + $0x2] ss:$9 sm:$0xff] %v789_v59 }
  0xa1   : > { %978 = vst [vmem:[#allocation1 + $0x3] ss:$9 sm:$0xff] %v792_v62 }
  0xa2   : > { %979 = vst [vmem:[#allocation1 + $0x4] ss:$9 sm:$0xff] %v795_v1 }
  0xa3   : > { %v1043_v6 = vpop.f32.mrf.mxu0  ;;  %981 = vst [vmem:[#allocation1 + $0x5] ss:$9 sm:$0xff] %v798_v2 }
  0xa4   : > { %983 = vst [vmem:[#allocation1 + $0x6] ss:$9 sm:$0xff] %v801_v3  ;;  %v1106_v34 = vmul.f32 %v3338_v22, %v1043_v6 }
  0xa5   : > { %985 = vst [vmem:[#allocation1 + $0x7] ss:$9 sm:$0xff] %v804_v5 }
  0xa6   : > { %2810 = vmatmul.msk.bf16.gmra.mxu0 %vm1005_vm5, %v971_v61  ;;  %v1133_v39 = vadd.f32 %v3346_v29, %v1106_v34 }
  0xa8   : > { %v1156_v47 = vmax.f32 %v1133_v39, 0.0 }
  0xaa   : > { %v1202_v50 = vrot.slane %v1156_v47, 2  ;;  %v1203_v51 = vrot.slane %v1156_v47, 4  ;;  %v1204_v53 = vrot.slane %v1156_v47, 6 }
  0xab   : > { %v1045_v16 = vpop.f32.mrf.mxu0 }
  0xac   : > { %v986_v21 = vld [vmem:[#allocation1] sm:$0xff]  ;;  %v1107_v25 = vmul.f32 %v3338_v22, %v1045_v16 }
  0xad   : > { %987 = vst [vmem:[#allocation1] ss:$9 sm:$0xff] %v807_v14 }
  0xae   : > { %988 = vst [vmem:[#allocation1 + $0x1] ss:$9 sm:$0xff] %v810_v17  ;;  %v1134_v30 = vadd.f32 %v3346_v29, %v1107_v25 }
  0xaf   : > { %990 = vst [vmem:[#allocation1 + $0x2] ss:$9 sm:$0xff] %v813_v18 }
  0xb0   : > { %992 = vst [vmem:[#allocation1 + $0x3] ss:$9 sm:$0xff] %v816_v19  ;;  %v1157_v36 = vmax.f32 %v1134_v30, 0.0 }
  0xb1   : > { %994 = vst [vmem:[#allocation1 + $0x4] ss:$9 sm:$0xff] %v819_v23 }
  0xb2   : > { %995 = vst [vmem:[#allocation1 + $0x5] ss:$9 sm:$0xff] %v822_v26  ;;  %v1205_v41 = vrot.slane %v1157_v36, 2  ;;  %v1206_v44 = vrot.slane %v1157_v36, 4  ;;  %v1207_v45 = vrot.slane %v1157_v36, 6 }
  0xb3   : > { %997 = vst [vmem:[#allocation1 + $0x6] ss:$9 sm:$0xff] %v825_v27  ;;  %v1048_v32 = vpop.f32.mrf.mxu0 }
  0xb4   : > { %999 = vst [vmem:[#allocation1 + $0x7] ss:$9 sm:$0xff] %v828_v28  ;;  %v1108_v38 = vmul.f32 %v3338_v22, %v1048_v32 }
  0xb6   : > { %2811 = vmatmul.msk.bf16.gmra.mxu0 %vm1005_vm5, %v986_v21  ;;  %v1135_v46 = vadd.f32 %v3346_v29, %v1108_v38 }
  0xb8   : > { %v1158_v49 = vmax.f32 %v1135_v46, 0.0 }
  0xba   : > { %v1208_v57 = vrot.slane %v1158_v49, 2  ;;  %v1209_v58 = vrot.slane %v1158_v49, 4  ;;  %v1210_v59 = vrot.slane %v1158_v49, 6 }
  0xbb   : > { %v1000_v42 = vld [vmem:[#allocation1] sm:$0xff]  ;;  %v1050_v43 = vpop.f32.mrf.mxu0 }
  0xbc   : > { %1002 = vst [vmem:[#allocation1] ss:$9 sm:$0xff] %v831_v37  ;;  %v1109_v48 = vmul.f32 %v3338_v22, %v1050_v43 }
  0xbd   : > { %1003 = vst [vmem:[#allocation1 + $0x1] ss:$9 sm:$0xff] %v834_v40 }
  0xbe   : > { %1387 = vst [vmem:[#allocation1 + $0x20] ss:$4 sm:$0xff] %v1157_v36  ;;  %v1136_v55 = vadd.f32 %v3346_v29, %v1109_v48 }
  0xbf   : > { %1389 = vst [vmem:[#allocation1 + $0x21] ss:$4 sm:$0xff] %v1205_v41 }
  0xc0   : > { %1391 = vst [vmem:[#allocation1 + $0x22] ss:$4 sm:$0xff] %v1206_v44  ;;  %v1159_v61 = vmax.f32 %v1136_v55, 0.0 }
  0xc1   : > { %1393 = vst [vmem:[#allocation1 + $0x23] ss:$4 sm:$0xff] %v1207_v45 }
  0xc2   : > { %v1211_v7 = vrot.slane %v1159_v61, 2  ;;  %v1212_v10 = vrot.slane %v1159_v61, 4  ;;  %v1213_v11 = vrot.slane %v1159_v61, 6 }
  0xc3   : > { %v1053_v52 = vpop.f32.mrf.mxu0 }
  0xc4   : > { %v1004_v54 = vld [vmem:[#allocation1] sm:$0xff]  ;;  %v1110_v56 = vmul.f32 %v3338_v22, %v1053_v52 }
  0xc5   : > { %1379 = vst [vmem:[#allocation1] ss:$4 sm:$0xff] %v1156_v47 }
  0xc6   : > { %1381 = vst [vmem:[#allocation1 + $0x1] ss:$4 sm:$0xff] %v1202_v50  ;;  %2812 = vmatmul.msk.bf16.gmra.mxu0 %vm1005_vm5, %v1000_v42  ;;  %v1137_v62 = vadd.f32 %v3346_v29, %v1110_v56 }
  0xc7   : > { %1383 = vst [vmem:[#allocation1 + $0x2] ss:$4 sm:$0xff] %v1203_v51 }
  0xc8   : > { %1385 = vst [vmem:[#allocation1 + $0x3] ss:$4 sm:$0xff] %v1204_v53  ;;  %v3361_v60 = vld.sshfl [vmem:[#allocation1 + $0x20] sm:$0xff pattern:$0x73625140]  ;;  %v1160_v0 = vmax.f32 %v1137_v62, 0.0 }
  0xc9   : > { %1398 = vst [vmem:[#allocation1 + $0x20] ss:$4 sm:$0xff] %v1208_v57 }
  0xca   : > { %1399 = vst [vmem:[#allocation1 + $0x21] ss:$4 sm:$0xff] %v1209_v58  ;;  %v1214_v3 = vrot.slane %v1160_v0, 2  ;;  %v1215_v23 = vrot.slane %v1160_v0, 4  ;;  %v1216_v25 = vrot.slane %v1160_v0, 6 }
  0xcb   : > { %1400 = vst [vmem:[#allocation1 + $0x22] ss:$4 sm:$0xff] %v1210_v59  ;;  %v1055_v63 = vpop.f32.mrf.mxu0 }
  0xcc   : > { %1401 = vst [vmem:[#allocation1 + $0x23] ss:$4 sm:$0xff] %v1159_v61  ;;  %v1111_v1 = vmul.f32 %v3338_v22, %v1055_v63 }
  0xce   : > { %v1138_v4 = vadd.f32 %v3346_v29, %v1111_v1 }
  0xcf   : > { %v3365_v2 = vld.sshfl [vmem:[#allocation1] sm:$0xff pattern:$0x73625140] }
  0xd0   : > { %1396 = vst [vmem:[#allocation1] ss:$4 sm:$0xff] %v1158_v49  ;;  %v1161_v8 = vmax.f32 %v1138_v4, 0.0 }
  0xd2   : > { %v1218_v14 = vrot.slane %v1161_v8, 4  ;;  %v1219_v16 = vrot.slane %v1161_v8, 6  ;;  %v1217_v27 = vrot.slane %v1161_v8, 2 }
  0xd3   : > { %v3368_v5 = vld.sshfl [vmem:[#allocation1 + $0x20] sm:$0xff pattern:$0x73625140]  ;;  %v1058_v6 = vpop.f32.mrf.mxu0 }
  0xd4   : > { %1407 = vst [vmem:[#allocation1 + $0x20] ss:$4 sm:$0xff] %v1214_v3  ;;  %v1112_v9 = vmul.f32 %v3338_v22, %v1058_v6 }
  0xd6   : > { %v1139_v12 = vadd.f32 %v3346_v29, %v1112_v9  ;;  %2813 = vmatmul.msk.bf16.gmra.mxu0 %vm1005_vm5, %v1004_v54 }
  0xd7   : > { %v3373_v13 = vld.sshfl [vmem:[#allocation1] sm:$0xff pattern:$0x73625140] }
  0xd8   : > { %1403 = vst [vmem:[#allocation1] ss:$4 sm:$0xff] %v1211_v7  ;;  %v1162_v15 = vmax.f32 %v1139_v12, 0.0 }
  0xd9   : > { %1404 = vst [vmem:[#allocation1 + $0x1] ss:$4 sm:$0xff] %v1212_v10 }
  0xda   : > { %1405 = vst [vmem:[#allocation1 + $0x2] ss:$4 sm:$0xff] %v1213_v11  ;;  %v1220_v18 = vrot.slane %v1162_v15, 2  ;;  %v1222_v31 = vrot.slane %v1162_v15, 6  ;;  %v1221_v36 = vrot.slane %v1162_v15, 4 }
  0xdb   : > { %1406 = vst [vmem:[#allocation1 + $0x3] ss:$4 sm:$0xff] %v1160_v0  ;;  %v3375_v17 = vld.sshfl [vmem:[#allocation1 + $0x20] sm:$0xff pattern:$0x73625140]  ;;  %v1060_v19 = vpop.f32.mrf.mxu0 }
  0xdc   : > { %1414 = vst [vmem:[#allocation1 + $0x20] ss:$4 sm:$0xff] %v1218_v14  ;;  %v1113_v20 = vmul.f32 %v3338_v22, %v1060_v19 }
  0xdd   : > { %1415 = vst [vmem:[#allocation1 + $0x21] ss:$4 sm:$0xff] %v1219_v16 }
  0xde   : > { %1416 = vst [vmem:[#allocation1 + $0x22] ss:$4 sm:$0xff] %v1162_v15  ;;  %v1140_v21 = vadd.f32 %v3346_v29, %v1113_v20 }
  0xdf   : > { %1417 = vst [vmem:[#allocation1 + $0x23] ss:$4 sm:$0xff] %v1220_v18 }
  0xe0   : > { %v1163_v24 = vmax.f32 %v1140_v21, 0.0 }
  0xe2   : > { %v3379_v26 = vld.sshfl [vmem:[#allocation1] sm:$0xff pattern:$0x73625140]  ;;  %v1223_v32 = vrot.slane %v1163_v24, 2  ;;  %v1224_v34 = vrot.slane %v1163_v24, 4  ;;  %v1225_v42 = vrot.slane %v1163_v24, 6 }
  0xe3   : > { %1410 = vst [vmem:[#allocation1] ss:$4 sm:$0xff] %v1215_v23  ;;  %v1063_v28 = vpop.f32.mrf.mxu0 }
  0xe4   : > { %1411 = vst [vmem:[#allocation1 + $0x1] ss:$4 sm:$0xff] %v1216_v25  ;;  %v1114_v30 = vmul.f32 %v3338_v22, %v1063_v28 }
  0xe5   : > { %1412 = vst [vmem:[#allocation1 + $0x2] ss:$4 sm:$0xff] %v1161_v8 }
  0xe6   : > { %1413 = vst [vmem:[#allocation1 + $0x3] ss:$4 sm:$0xff] %v1217_v27  ;;  %v3382_v33 = vld.sshfl [vmem:[#allocation1 + $0x20] sm:$0xff pattern:$0x73625140]  ;;  %v1141_v35 = vadd.f32 %v3346_v29, %v1114_v30 }
  0xe7   : > { %1422 = vst [vmem:[#allocation1 + $0x20] ss:$4 sm:$0xff] %v1222_v31 }
  0xe8   : > { %1423 = vst [vmem:[#allocation1 + $0x21] ss:$4 sm:$0xff] %v1163_v24  ;;  %v1164_v37 = vmax.f32 %v1141_v35, 0.0 }
  0xe9   : > { %1424 = vst [vmem:[#allocation1 + $0x22] ss:$4 sm:$0xff] %v1223_v32 }
  0xea   : > { %1425 = vst [vmem:[#allocation1 + $0x23] ss:$4 sm:$0xff] %v1224_v34  ;;  %v1228_v40 = vrot.slane %v1164_v37, 6  ;;  %v1226_v45 = vrot.slane %v1164_v37, 2  ;;  %v1227_v48 = vrot.slane %v1164_v37, 4 }
  0xeb   : > { %v1065_v38 = vpop.f32.mrf.mxu0 }
  0xec   : > { %v1115_v43 = vmul.f32 %v3338_v22, %v1065_v38 }
  0xed   : > { %v3385_v39 = vld.sshfl [vmem:[#allocation1] sm:$0xff pattern:$0x73625140] }
  0xee   : > { %1420 = vst [vmem:[#allocation1] ss:$4 sm:$0xff] %v1221_v36  ;;  %v1142_v49 = vadd.f32 %v3346_v29, %v1115_v43 }
  0xf0   : > { %v1165_v53 = vmax.f32 %v1142_v49, 0.0  ;;  %v3425_v49 = vstv %s3422_s17  ;;  %s4488_s17 = smov (!%p458_p6, %s3422_s17), 15 }
  0xf1   : > { %v3387_v41 = vld.sshfl [vmem:[#allocation1 + $0x20] sm:$0xff pattern:$0x73625140]  ;;  %vm1283_vm11 = vcmp.eq.s32.totalorder %v3425_v49, 0  ;;  %vm1293_vm12 = vcmp.eq.s32.totalorder %v3425_v49, 17  ;;  %s2796_s23 = sshll.u32 %s4488_s17, 1 }
  0xf2   : > { %1431 = vst [vmem:[#allocation1 + $0x20] ss:$4 sm:$0xff] %v1228_v40  ;;  %v1229_v59 = vrot.slane %v1165_v53, 2  ;;  %v1230_v62 = vrot.slane %v1165_v53, 4  ;;  %v1231_v0 = vrot.slane %v1165_v53, 6  ;;  %vm3456_vm14 = vmor %vm1283_vm11, %vm1293_vm12  ;;  %vm2019_vm12 = vcmask 1045504  }
  0xf3   : > { %v1068_v44 = vpop.f32.mrf.mxu0 }
  0xf4   : > { %v1116_v46 = vmul.f32 %v3338_v22, %v1068_v44 }
  0xf5   : > { %v3391_v47 = vld.sshfl [vmem:[#allocation1] sm:$0xff pattern:$0x73625140] }
  0xf6   : > { %1427 = vst [vmem:[#allocation1] ss:$4 sm:$0xff] %v1225_v42  ;;  %v1143_v50 = vadd.f32 %v3346_v29, %v1116_v46 }
  0xf7   : > { %1428 = vst [vmem:[#allocation1 + $0x1] ss:$4 sm:$0xff] %v1164_v37 }
  0xf8   : > { %1429 = vst [vmem:[#allocation1 + $0x2] ss:$4 sm:$0xff] %v1226_v45  ;;  %v1166_v51 = vmax.f32 %v1143_v50, 0.0 }
  0xf9   : > { %1430 = vst [vmem:[#allocation1 + $0x3] ss:$4 sm:$0xff] %v1227_v48  ;;  %v3395_v52 = vld.sshfl [vmem:[#allocation1 + $0x20] sm:$0xff pattern:$0x73625140] }
  0xfa   : > { %v1232_v54 = vrot.slane %v1166_v51, 2  ;;  %v1233_v55 = vrot.slane %v1166_v51, 4  ;;  %v1234_v56 = vrot.slane %v1166_v51, 6  ;;  %1438 = vst [vmem:[#allocation1 + $0x20] ss:$4 sm:$0xff] %v1166_v51  ;;  %v1275_v51 = vadd.s32 6, %v3425_v49 }
  0xfb   : > { %v1070_v57 = vpop.f32.mrf.mxu0 }
  0xfc   : > { %1439 = vst [vmem:[#allocation1 + $0x21] ss:$4 sm:$0xff] %v1232_v54  ;;  %v1117_v58 = vmul.f32 %v3338_v22, %v1070_v57  ;;  %vm1289_vm6 = vcmp.eq.s32.totalorder %v1275_v51, 0  ;;  %vm1299_vm7 = vcmp.eq.s32.totalorder %v1275_v51, 17 }
  0xfd   : > { %1440 = vst [vmem:[#allocation1 + $0x22] ss:$4 sm:$0xff] %v1233_v55  ;;  %vm3432_vm8 = vmor %vm1289_vm6, %vm1299_vm7 }
  0xfe   : > { %1441 = vst [vmem:[#allocation1 + $0x23] ss:$4 sm:$0xff] %v1234_v56  ;;  %v1144_v61 = vadd.f32 %v3346_v29, %v1117_v58 }
 0x100   : > { %v3399_v63 = vld.sshfl [vmem:[#allocation1] sm:$0xff pattern:$0x73625140]  ;;  %v1167_v1 = vmax.f32 %v1144_v61, 0.0 }
 0x101   : > { %1434 = vst [vmem:[#allocation1] ss:$4 sm:$0xff] %v1165_v53  ;;  %v1279_v53 = vlaneseq }
 0x102   : > { %1435 = vst [vmem:[#allocation1 + $0x1] ss:$4 sm:$0xff] %v1229_v59  ;;  %v1235_v3 = vrot.slane %v1167_v1, 2  ;;  %v1236_v4 = vrot.slane %v1167_v1, 4  ;;  %v1237_v7 = vrot.slane %v1167_v1, 6 }
 0x103   : > { %1436 = vst [vmem:[#allocation1 + $0x2] ss:$4 sm:$0xff] %v1230_v62  ;;  %v1073_v6 = vpop.f32.mrf.mxu0  ;;  %v3430_v57 = vshrl.u32 %v1279_v53, 7  ;;  %v1272_v62 = vadd.s32 3, %v3425_v49 }
 0x104   : > { %1437 = vst [vmem:[#allocation1 + $0x3] ss:$4 sm:$0xff] %v1231_v0  ;;  %v1118_v8 = vmul.f32 %v3338_v22, %v1073_v6 }
 0x105   : > { %v3402_v9 = vld.sshfl [vmem:[#allocation1 + $0x20] sm:$0xff pattern:$0x73625140]  ;;  %v3438_v6 = vadd.s32 16, %v3430_v57  ;;  %vm1313_vm9 = vcmp.eq.s32.totalorder %v3430_v57, 0 }
 0x106   : > { %1446 = vst [vmem:[#allocation1 + $0x20] ss:$4 sm:$0xff] %v1235_v3  ;;  %v1145_v10 = vadd.f32 %v3346_v29, %v1118_v8  ;;  %vm1334_vm10 = vmor %vm3432_vm8, %vm1313_vm9 }
 0x107   : > { %1447 = vst [vmem:[#allocation1 + $0x21] ss:$4 sm:$0xff] %v1236_v4  ;;  %vm1348_vm13 = vcmp.eq.s32.totalorder %v3438_v6, 17  ;;  %vm1316_vm3 = vmor %vm3456_vm14, %vm1313_vm9 }
 0x108   : > { %1448 = vst [vmem:[#allocation1 + $0x22] ss:$4 sm:$0xff] %v1237_v7  ;;  %v1168_v11 = vmax.f32 %v1145_v10, 0.0  ;;  %v1270_v10 = vadd.s32 1, %v3425_v49  ;;  %vm1369_vm15 = vmor %vm3432_vm8, %vm1348_vm13 }
 0x10a   : > { %1449 = vst [vmem:[#allocation1 + $0x23] ss:$4 sm:$0xff] %v1168_v11  ;;  %v1238_v19 = vrot.slane %v1168_v11, 2  ;;  %v1239_v20 = vrot.slane %v1168_v11, 4  ;;  %v1240_v23 = vrot.slane %v1168_v11, 6  ;;  %vm1284_vm2 = vcmp.eq.s32.totalorder %v1270_v10, 0 }
 0x10b   : > { %v3405_v12 = vld.sshfl [vmem:[#allocation1] sm:$0xff pattern:$0x73625140]  ;;  %v1075_v14 = vpop.f32.mrf.mxu0  ;;  %vm1294_vm7 = vcmp.eq.s32.totalorder %v1270_v10, 17 }
 0x10c   : > { %1444 = vst [vmem:[#allocation1] ss:$4 sm:$0xff] %v1167_v1  ;;  %v1119_v15 = vmul.f32 %v3338_v22, %v1075_v14  ;;  %vm3499_vm11 = vmor %vm1284_vm2, %vm1294_vm7  ;;  %vm1286_vm7 = vcmp.eq.s32.totalorder %v1272_v62, 0 }
 0x10e   : > { %v1146_v16 = vadd.f32 %v3346_v29, %v1119_v15 }
 0x110   : > { %v1169_v18 = vmax.f32 %v1146_v16, 0.0 }
 0x111   : > { %v3409_v24 = vld.sshfl [vmem:[#allocation1 + $0x20] sm:$0xff pattern:$0x73625140] }
 0x112   : > { %v1241_v21 = vrot.slane %v1169_v18, 2  ;;  %v1242_v38 = vrot.slane %v1169_v18, 4  ;;  %v1243_v42 = vrot.slane %v1169_v18, 6 }
 0x113   : > { %v1078_v25 = vpop.f32.mrf.mxu0  ;;  %v3412_v28 = vld.sshfl [vmem:[#allocation1] sm:$0xff pattern:$0x73625140] }
 0x114   : > { %1455 = vst [vmem:[#allocation1 + $0x20] ss:$4 sm:$0xff] %v1241_v21  ;;  %v1120_v27 = vmul.f32 %v3338_v22, %v1078_v25 }
 0x115   : > { %1451 = vst [vmem:[#allocation1] ss:$4 sm:$0xff] %v1238_v19 }
 0x116   : > { %v1147_v30 = vadd.f32 %v3346_v29, %v1120_v27  ;;  %1452 = vst [vmem:[#allocation1 + $0x1] ss:$4 sm:$0xff] %v1239_v20 }
 0x117   : > { %1453 = vst [vmem:[#allocation1 + $0x2] ss:$4 sm:$0xff] %v1240_v23 }
 0x118   : > { %v1170_v31 = vmax.f32 %v1147_v30, 0.0  ;;  %1454 = vst [vmem:[#allocation1 + $0x3] ss:$4 sm:$0xff] %v1169_v18  ;;  %v1276_v18 = vadd.s32 7, %v3425_v49 }
 0x11a   : > { %v1245_v32 = vrot.slane %v1170_v31, 4  ;;  %v1246_v34 = vrot.slane %v1170_v31, 6  ;;  %v1244_v45 = vrot.slane %v1170_v31, 2  ;;  %vm1290_vm4 = vcmp.eq.s32.totalorder %v1276_v18, 0 }
 0x11b   : > { %v3415_v35 = vld.sshfl [vmem:[#allocation1 + $0x20] sm:$0xff pattern:$0x73625140]  ;;  %v1080_v36 = vpop.f32.mrf.mxu0  ;;  %vm1300_vm6 = vcmp.eq.s32.totalorder %v1276_v18, 17 }
 0x11c   : > { %1462 = vst [vmem:[#allocation1 + $0x20] ss:$4 sm:$0xff] %v1245_v32  ;;  %v1121_v37 = vmul.f32 %v3338_v22, %v1080_v36 }
 0x11d   : > { %1463 = vst [vmem:[#allocation1 + $0x21] ss:$4 sm:$0xff] %v1246_v34 }
 0x11e   : > { %v1148_v40 = vadd.f32 %v3346_v29, %v1121_v37 }
 0x11f   : > { %v3419_v43 = vld.sshfl [vmem:[#allocation1] sm:$0xff pattern:$0x73625140] }
 0x120   : > { %v1171_v44 = vmax.f32 %v1148_v40, 0.0  ;;  %1458 = vst [vmem:[#allocation1] ss:$4 sm:$0xff] %v1242_v38  ;;  %v3488_v40 = vsel %vm1316_vm3, 0.0, %v3365_v2 }
 0x121   : > { %1459 = vst [vmem:[#allocation1 + $0x1] ss:$4 sm:$0xff] %v1243_v42 }
 0x122   : > { %v1247_v46 = vrot.slane %v1171_v44, 2  ;;  %1464 = vst [vmem:[#allocation1 + $0x22] ss:$4 sm:$0xff] %v1171_v44  ;;  %v1248_v56 = vrot.slane %v1171_v44, 4  ;;  %v1249_v58 = vrot.slane %v1171_v44, 6 }
 0x123   : > { %v1083_v48 = vpop.f32.mrf.mxu0  ;;  %1460 = vst [vmem:[#allocation1 + $0x2] ss:$4 sm:$0xff] %v1170_v31  ;;  %v3475_v31 = vsel %vm3456_vm14, 0.0, %v3361_v60 }
 0x124   : > { %1465 = vst [vmem:[#allocation1 + $0x23] ss:$4 sm:$0xff] %v1247_v46  ;;  %v1122_v50 = vmul.f32 %v3338_v22, %v1083_v48  ;;  %v1271_v48 = vadd.s32 2, %v3425_v49 }
 0x125   : > { %1461 = vst [vmem:[#allocation1 + $0x3] ss:$4 sm:$0xff] %v1244_v45  ;;  %v1910_v45 = vrot.slane %v3475_v31, 1 }
 0x126   : > { %v1149_v54 = vadd.f32 %v3346_v29, %v1122_v50  ;;  %vm1285_vm2 = vcmp.eq.s32.totalorder %v1271_v48, 0  ;;  %vm1295_vm3 = vcmp.eq.s32.totalorder %v1271_v48, 17 }
 0x128   : > { %v1172_v55 = vmax.f32 %v1149_v54, 0.0 }
 0x12a   : > { %v1250_v59 = vrot.slane %v1172_v55, 2  ;;  %v1251_v1 = vrot.slane %v1172_v55, 4  ;;  %v1252_v14 = vrot.slane %v1172_v55, 6 }
 0x12b   : > { %v1085_v61 = vpop.f32.mrf.mxu0  ;;  %v1467_v0 = vld.sshfl [vmem:[#allocation1 + $0x20] sm:$0xff pattern:$0x73625140] }
 0x12c   : > { %v1123_v3 = vmul.f32 %v3338_v22, %v1085_v61  ;;  %v1466_v4 = vld.sshfl [vmem:[#allocation1] sm:$0xff pattern:$0x73625140]  ;;  %1470 = vst [vmem:[#allocation1 + $0x20] ss:$4 sm:$0xff] %v1249_v58  ;;  %v3450_v8 = vsel %vm3432_vm8, 0.0, %v1467_v0  ;;  %vm3483_vm8 = vmor %vm3456_vm14, %vm1348_vm13 }
 0x12d   : > { %1468 = vst [vmem:[#allocation1] ss:$4 sm:$0xff] %v1248_v56  ;;  %v3454_v15 = vsel %vm1334_vm10, 0.0, %v1466_v4  ;;  %v1940_v19 = vrot.slane %v3450_v8, 1  ;;  %vm3492_vm10 = vmor %vm1290_vm4, %vm1300_vm6  ;;  %v2051_v53 = vrot.slane %v3450_v8, 2  ;;  %v2020_v0 = vrot.slane %v3488_v40, 2 }
 0x12e   : > { %v1150_v7 = vadd.f32 %v3346_v29, %v1123_v3  ;;  %1471 = vst [vmem:[#allocation1 + $0x21] ss:$4 sm:$0xff] %v1172_v55  ;;  %v1939_v27 = vrot.slane %v3454_v15, 1  ;;  %v1909_v55 = vrot.slane %v3488_v40, 1  ;;  %vm3508_vm14 = vmor %vm3499_vm11, %vm1348_vm13  ;;  %v2050_v58 = vrot.slane %v3454_v15, 2 }
 0x12f   : > { %1472 = vst [vmem:[#allocation1 + $0x22] ss:$4 sm:$0xff] %v1250_v59  ;;  %vm1372_vm4 = vmor %vm3492_vm10, %vm1348_vm13 }
 0x130   : > { %v1173_v11 = vmax.f32 %v1150_v7, 0.0  ;;  %1473 = vst [vmem:[#allocation1 + $0x23] ss:$4 sm:$0xff] %v1251_v1  ;;  %v1941_v36 = vsel %vm1908_vm1, %v1939_v27, %v1940_v19  ;;  %v2021_v1 = vrot.slane %v3475_v31, 2  ;;  %v3529_v4 = vsel %vm1908_vm1, %v1909_v55, %v1910_v45  ;;  %vm3561_vm6 = vmor %vm3499_vm11, %vm1313_vm9 }
 0x131   : > { %v2052_v7 = vsel %vm2019_vm12, %v2050_v58, %v2051_v53 }
 0x132   : > { %v1253_v20 = vrot.slane %v1173_v11, 2  ;;  %v1254_v23 = vrot.slane %v1173_v11, 4  ;;  %v1255_v32 = vrot.slane %v1173_v11, 6 }
 0x133   : > { %v1088_v21 = vpop.f32.mrf.mxu0 }
 0x134   : > { %v1469_v25 = vld.sshfl [vmem:[#allocation1] sm:$0xff pattern:$0x73625140]  ;;  %v1124_v30 = vmul.f32 %v3338_v22, %v1088_v21 }
 0x135   : > { %v1556_v34 = vsel %vm1369_vm15, 0.0, %v1469_v25  ;;  %1475 = vst [vmem:[#allocation1] ss:$4 sm:$0xff] %v1252_v14  ;;  %vm3518_vm15 = vmor %vm3492_vm10, %vm1313_vm9  ;;  %v3541_v14 = vsel %vm3508_vm14, 0.0, %v3375_v17 }
 0x136   : > { %v1942_v37 = vrot.slane %v1556_v34, 1  ;;  %1476 = vst [vmem:[#allocation1 + $0x1] ss:$4 sm:$0xff] %v1173_v11  ;;  %v1151_v38 = vadd.f32 %v3346_v29, %v1124_v30  ;;  %v2053_v50 = vrot.slane %v1556_v34, 2  ;;  %v3536_v11 = vsel %vm3483_vm8, 0.0, %v3373_v13 }
 0x137   : > { %1477 = vst [vmem:[#allocation1 + $0x2] ss:$4 sm:$0xff] %v1253_v20  ;;  %v1474_v42 = vld.sshfl [vmem:[#allocation1 + $0x20] sm:$0xff pattern:$0x73625140]  ;;  %v3555_v13 = vsel %vm3499_vm11, 0.0, %v3379_v26 }
 0x138   : > { %v1943_v44 = vsel %vm1908_vm1, %v1940_v19, %v1942_v37  ;;  %1478 = vst [vmem:[#allocation1 + $0x3] ss:$4 sm:$0xff] %v1254_v23  ;;  %v1174_v54 = vmax.f32 %v1151_v38, 0.0  ;;  %v2054_v10 = vsel %vm2019_vm12, %v2051_v53, %v2053_v50  ;;  %v3550_v19 = vsel %vm3518_vm15, 0.0, %v1474_v42 }
 0x139   : > { %v2922_v51 = vpack.i.bf16 %v1943_v44, %v1941_v36  ;;  %1479 = vst [vmem:[#allocation1 + $0x20] ss:$4 sm:$0xff] %v1255_v32  ;;  %vm1296_vm8 = vcmp.eq.s32.totalorder %v1272_v62, 17  ;;  %v3568_v23 = vsel %vm2019_vm12, %v2020_v0, %v2021_v1  ;;  %v2927_v26 = vpack.i.bf16 %v2054_v10, %v2052_v7 }
 0x13a   : > { %v1256_v16 = vrot.slane %v1174_v54, 2  ;;  %v1257_v20 = vrot.slane %v1174_v54, 4  ;;  %v1258_v25 = vrot.slane %v1174_v54, 6  ;;  %v1944_v36 = vrot.slane %v3550_v19, 1  ;;  %vm3598_vm11 = vmor %vm1286_vm7, %vm1296_vm8 }
 0x13b   : > { %2923 = vrot.lane.b32.xlu0 %v2922_v51, %s3094_s25  ;;  %v1090_v59 = vpop.f32.mrf.mxu0  ;;  %v1277_v38 = vadd.s32 8, %v3425_v49  ;;  %v1912_v42 = vrot.slane %v3536_v11, 1  ;;  %v3581_v50 = vsel %vm3561_vm6, 0.0, %v3368_v5  ;;  %v2028_v2 = vrot.slane %v3541_v14, 2  ;;  %vm3666_vm7 = vmor %vm3598_vm11, %vm1348_vm13 }
 0x13c   : > { %v1125_v3 = vmul.f32 %v3338_v22, %v1090_v59  ;;  %v2023_v55 = vrot.slane %v3536_v11, 2  ;;  %v2026_v59 = vrot.slane %v3555_v13, 2  ;;  %v1915_v0 = vrot.slane %v3555_v13, 1 }
 0x13d   : > { %vm1291_vm14 = vcmp.eq.s32.totalorder %v1277_v38, 0  ;;  %vm1301_vm15 = vcmp.eq.s32.totalorder %v1277_v38, 17 }
 0x13e   : > { %v1152_v18 = vadd.f32 %v3346_v29, %v1125_v3  ;;  %v1913_v3 = vsel %vm1908_vm1, %v1910_v45, %v1912_v42 }
 0x13f   : > { %v1480_v17 = vld.sshfl [vmem:[#allocation1] sm:$0xff pattern:$0x73625140] }
 0x140   : > { %v1175_v27 = vmax.f32 %v1152_v18, 0.0  ;;  %v1481_v30 = vld.sshfl [vmem:[#allocation1 + $0x20] sm:$0xff pattern:$0x73625140]  ;;  %v3572_v32 = vsel %vm3492_vm10, 0.0, %v1480_v17  ;;  %vm3588_vm10 = vmor %vm1285_vm2, %vm1295_vm3  ;;  %v1914_v18 = vrot.slane %v3581_v50, 1 }
 0x141   : > { %v1559_v34 = vsel %vm1372_vm4, 0.0, %v1481_v30  ;;  %v1945_v37 = vrot.slane %v3572_v32, 1  ;;  %1482 = vst [vmem:[#allocation1] ss:$4 sm:$0xff] %v1174_v54  ;;  %v2056_v62 = vrot.slane %v3572_v32, 2  ;;  %vm3612_vm2 = vmor %vm3588_vm10, %vm1313_vm9  ;;  %v3631_v17 = vsel %vm3588_vm10, 0.0, %v3382_v33 }
 0x142   : > { %v1259_v60 = vrot.slane %v1175_v27, 2  ;;  %v1947_v44 = vrot.slane %v1559_v34, 1  ;;  %1483 = vst [vmem:[#allocation1 + $0x1] ss:$4 sm:$0xff] %v1256_v16  ;;  %v1260_v46 = vrot.slane %v1175_v27, 4  ;;  %v1261_v5 = vrot.slane %v1175_v27, 6  ;;  %vm3622_vm3 = vmor %vm3598_vm11, %vm1313_vm9 }
 0x143   : > { %2928 = vrot.lane.b32.xlu0 %v2927_v26, %s3095_s18  ;;  %v1946_v51 = vsel %vm1908_vm1, %v1944_v36, %v1945_v37  ;;  %1484 = vst [vmem:[#allocation1 + $0x2] ss:$4 sm:$0xff] %v1257_v20  ;;  %v1093_v53 = vpop.f32.mrf.mxu0  ;;  %v2058_v7 = vrot.slane %v1559_v34, 2  ;;  %v2025_v16 = vrot.slane %v3581_v50, 2  ;;  %v1273_v20 = vadd.s32 4, %v3425_v49  ;;  %vm3637_vm4 = vmor %vm1291_vm14, %vm1301_vm15 }
 0x144   : > { %v1948_v56 = vsel %vm1908_vm1, %v1945_v37, %v1947_v44  ;;  %1485 = vst [vmem:[#allocation1 + $0x3] ss:$4 sm:$0xff] %v1258_v25  ;;  %v1126_v58 = vmul.f32 %v3338_v22, %v1093_v53  ;;  %v2029_v25 = vsel %vm2019_vm12, %v2026_v59, %v2028_v2  ;;  %v2055_v26 = vrot.slane %v3550_v19, 2  ;;  %vm3656_vm6 = vmor %vm3588_vm10, %vm1348_vm13 }
 0x145   : > { %v2932_v48 = vpack.i.bf16 %v1948_v56, %v1946_v51  ;;  %1486 = vst [vmem:[#allocation1 + $0x20] ss:$4 sm:$0xff] %v1175_v27  ;;  %v3644_v30 = vsel %vm2019_vm12, %v2021_v1, %v2023_v55  ;;  %v2952_v33 = vpack.i.bf16 %v1913_v3, %v3529_v4  ;;  %v2027_v34 = vsel %vm2019_vm12, %v2025_v16, %v2026_v59  ;;  %vm1340_vm8 = vmor %vm3637_vm4, %vm1313_vm9 }
 0x146   : > { %1487 = vst [vmem:[#allocation1 + $0x21] ss:$4 sm:$0xff] %v1259_v60  ;;  %v1153_v10 = vadd.f32 %v3346_v29, %v1126_v58  ;;  %v3649_v36 = vsel %vm1908_vm1, %v1914_v18, %v1915_v0  ;;  %v1917_v37 = vrot.slane %v3541_v14, 1  ;;  %v2057_v1 = vsel %vm2019_vm12, %v2055_v26, %v2056_v62 }
 0x147   : > { %2933 = vrot.lane.b32.xlu1 %v2932_v48, %s3094_s25  ;;  %1488 = vst [vmem:[#allocation1 + $0x22] ss:$4 sm:$0xff] %v1260_v46  ;;  %v2059_v60 = vsel %vm2019_vm12, %v2056_v62, %v2058_v7  ;;  %v3673_v14 = vsel %vm3612_vm2, 0.0, %v3385_v39  ;;  %v1920_v42 = vrot.slane %v3631_v17, 1  ;;  %v2967_v44 = vpack.i.bf16 %v2029_v25, %v2027_v34  ;;  %vm3736_vm2 = vmor %vm3637_vm4, %vm1348_vm13 }
 0x148   : > { %1489 = vst [vmem:[#allocation1 + $0x23] ss:$4 sm:$0xff] %v1261_v5  ;;  %v1176_v21 = vmax.f32 %v1153_v10, 0.0  ;;  %v3680_v51 = vsel %vm3622_vm3, 0.0, %v3387_v41  ;;  %vm1287_vm10 = vcmp.eq.s32.totalorder %v1273_v20, 0  ;;  %vm1297_vm14 = vcmp.eq.s32.totalorder %v1273_v20, 17 }
 0x149   : > { %v3690_v54 = vsel %vm3598_vm11, 0.0, %v3399_v63  ;;  %v3695_v41 = vsel %vm3656_vm6, 0.0, %v3391_v47  ;;  %v2937_v5 = vpack.i.bf16 %v2059_v60, %v2057_v1  ;;  %v3700_v56 = vsel %vm3666_vm7, 0.0, %v3395_v52  ;;  %vm3713_vm11 = vmor %vm1287_vm10, %vm1297_vm14 }
 0x14a   : > { %v1262_v39 = vrot.slane %v1176_v21, 2  ;;  %v1263_v55 = vrot.slane %v1176_v21, 4  ;;  %v1274_v58 = vadd.s32 5, %v3425_v49  ;;  %v1264_v59 = vrot.slane %v1176_v21, 6  ;;  %vm3727_vm15 = vmor %vm3713_vm11, %vm1348_vm13 }
 0x14b   : > { %2953 = vrot.lane.b32.xlu0 %v2952_v33, %s3094_s25  ;;  %v1095_v46 = vpop.f32.mrf.mxu0  ;;  %v1490_v53 = vld.sshfl [vmem:[#allocation1] sm:$0xff pattern:$0x73625140]  ;;  %v2031_v48 = vrot.slane %v3631_v17, 2  ;;  %v1924_v47 = vrot.slane %v3680_v51, 1  ;;  %v1925_v3 = vrot.slane %v3690_v54, 1  ;;  %v1918_v7 = vsel %vm1908_vm1, %v1915_v0, %v1917_v37  ;;  %vm3786_vm14 = vmor %vm3713_vm11, %vm1313_vm9 }
 0x14c   : > { %v1127_v2 = vmul.f32 %v3338_v22, %v1095_v46  ;;  %1492 = vst [vmem:[#allocation1] ss:$4 sm:$0xff] %v1176_v21  ;;  %v3704_v63 = vsel %vm1340_vm8, 0.0, %v1490_v53  ;;  %v1919_v62 = vrot.slane %v3673_v14, 1  ;;  %v1927_v16 = vrot.slane %v3700_v56, 1 }
 0x14d   : > { %v1922_v18 = vrot.slane %v3695_v41, 1  ;;  %v1949_v21 = vrot.slane %v3704_v63, 1  ;;  %vm1288_vm3 = vcmp.eq.s32.totalorder %v1274_v58, 0  ;;  %v1278_v26 = vadd.s32 9, %v3425_v49 }
 0x14e   : > { %v1154_v61 = vadd.f32 %v3346_v29, %v1127_v2  ;;  %vm1298_vm6 = vcmp.eq.s32.totalorder %v1274_v58, 17  ;;  %v1926_v27 = vsel %vm1908_vm1, %v1924_v47, %v1925_v3  ;;  %v2957_v38 = vpack.i.bf16 %v1918_v7, %v3649_v36 }
 0x14f   : > { %2938 = vrot.lane.b32.xlu1 %v2937_v5, %s3095_s18  ;;  %v1491_v10 = vld.sshfl [vmem:[#allocation1 + $0x20] sm:$0xff pattern:$0x73625140]  ;;  %v1921_v4 = vsel %vm1908_vm1, %v1919_v62, %v1920_v42  ;;  %v2030_v49 = vrot.slane %v3673_v14, 2  ;;  %v1928_v46 = vsel %vm1908_vm1, %v1925_v3, %v1927_v16  ;;  %v3757_v36 = vsel %vm3727_vm15, 0.0, %v3412_v28 }
 0x150   : > { %v1177_v11 = vmax.f32 %v1154_v61, 0.0  ;;  %v3721_v45 = vsel %vm3637_vm4, 0.0, %v1491_v10  ;;  %1494 = vst [vmem:[#allocation1 + $0x20] ss:$4 sm:$0xff] %v1262_v39  ;;  %vm3762_vm4 = vmor %vm1288_vm3, %vm1298_vm6  ;;  %vm1292_vm7 = vcmp.eq.s32.totalorder %v1278_v26, 0  ;;  %vm1302_vm8 = vcmp.eq.s32.totalorder %v1278_v26, 17 }
 0x151   : > { %v1950_v25 = vrot.slane %v3721_v45, 1  ;;  %1495 = vst [vmem:[#allocation1 + $0x21] ss:$4 sm:$0xff] %v1263_v55  ;;  %v1923_v28 = vsel %vm1908_vm1, %v1920_v42, %v1922_v18  ;;  %v2035_v5 = vrot.slane %v3680_v51, 2  ;;  %vm3775_vm10 = vmor %vm3762_vm4, %vm1348_vm13  ;;  %v2982_v61 = vpack.i.bf16 %v1928_v46, %v1926_v27 }
 0x152   : > { %v1265_v33 = vrot.slane %v1177_v11, 2  ;;  %v1266_v34 = vrot.slane %v1177_v11, 4  ;;  %v1267_v37 = vrot.slane %v1177_v11, 6  ;;  %1496 = vst [vmem:[#allocation1 + $0x22] ss:$4 sm:$0xff] %v1264_v59  ;;  %v2033_v59 = vrot.slane %v3695_v41, 2  ;;  %vm3800_vm15 = vmor %vm1292_vm7, %vm1302_vm8 }
 0x153   : > { %2968 = vrot.lane.b32.xlu0 %v2967_v44, %s3095_s18  ;;  %v1098_v1 = vpop.f32.mrf.mxu0  ;;  %v1493_v60 = vld.sshfl [vmem:[#allocation1] sm:$0xff pattern:$0x73625140]  ;;  %1497 = vst [vmem:[#allocation1 + $0x23] ss:$4 sm:$0xff] %v1177_v11  ;;  %v1951_v39 = vsel %vm1908_vm1, %v1949_v21, %v1950_v25  ;;  %v2036_v47 = vrot.slane %v3690_v54, 2  ;;  %v2962_v52 = vpack.i.bf16 %v3644_v30, %v3568_v23  ;;  %v2972_v26 = vpack.i.bf16 %v1923_v28, %v1921_v4 }
 0x154   : > { %v1128_v53 = vmul.f32 %v3338_v22, %v1098_v1  ;;  %v1562_v44 = vsel %vm3736_vm2, 0.0, %v1493_v60  ;;  %1499 = vst [vmem:[#allocation1] ss:$4 sm:$0xff] %v1265_v33  ;;  %v2038_v3 = vrot.slane %v3700_v56, 2  ;;  %v3795_v41 = vsel %vm3713_vm11, 0.0, %v3402_v9  ;;  %vm3818_vm11 = vmor %vm3762_vm4, %vm1313_vm9 }
 0x155   : > { %v1952_v2 = vrot.slane %v1562_v44, 1  ;;  %1500 = vst [vmem:[#allocation1 + $0x1] ss:$4 sm:$0xff] %v1266_v34  ;;  %v2043_v62 = vrot.slane %v3757_v36, 2  ;;  %v2063_v16 = vrot.slane %v1562_v44, 2  ;;  %v2060_v0 = vrot.slane %v3704_v63, 2  ;;  %vm1343_vm2 = vmor %vm3800_vm15, %vm1313_vm9 }
 0x156   : > { %v1155_v22 = vadd.f32 %v3346_v29, %v1128_v53  ;;  %1501 = vst [vmem:[#allocation1 + $0x2] ss:$4 sm:$0xff] %v1267_v37  ;;  %v2061_v56 = vrot.slane %v3721_v45, 2  ;;  %v3809_v18 = vsel %vm3775_vm10, 0.0, %v3415_v35  ;;  %v3825_v35 = vsel %vm2019_vm12, %v2030_v49, %v2031_v48  ;;  %vm3878_vm9 = vmor %vm3800_vm15, %vm1348_vm13 }
 0x157   : > { %2958 = vrot.lane.b32.xlu1 %v2957_v38, %s3094_s25  ;;  %v1953_v29 = vsel %vm1908_vm1, %v1950_v25, %v1952_v2  ;;  %v3831_v25 = vsel %vm3786_vm14, 0.0, %v3405_v12  ;;  %v3836_v33 = vsel %vm3762_vm4, 0.0, %v3419_v43  ;;  %v3845_v34 = vsel %vm2019_vm12, %v2031_v48, %v2033_v59 }
 0x158   : > { %v1178_v7 = vmax.f32 %v1155_v22, 0.0  ;;  %v2942_v10 = vpack.i.bf16 %v1953_v29, %v1951_v39  ;;  %v2041_v12 = vrot.slane %v3795_v41, 2  ;;  %v2037_v27 = vsel %vm2019_vm12, %v2035_v5, %v2036_v47 }
 0x159   : > { %v2039_v38 = vsel %vm2019_vm12, %v2036_v47, %v2038_v3  ;;  %v1937_v43 = vrot.slane %v3809_v18, 1  ;;  %v2062_v57 = vsel %vm2019_vm12, %v2060_v0, %v2061_v56  ;;  %v2064_v1 = vsel %vm2019_vm12, %v2061_v56, %v2063_v16  ;;  %v1737_v3 = vld [vmem:[%s4421_s10] sm:$0xf] }
 0x15a   : > { %v1268_v9 = vrot.slane %v1178_v7, 2  ;;  %2943 = vrot.lane.b32.xlu2 %v2942_v10, %s3094_s25  ;;  %1502 = vst [vmem:[#allocation1 + $0x3] ss:$4 sm:$0xff] %v1178_v7  ;;  %v1498_v21 = vld.sshfl [vmem:[#allocation1 + $0x20] sm:$0xff pattern:$0x73625140]  ;;  %v2044_v49 = vsel %vm2019_vm12, %v2041_v12, %v2043_v62  ;;  %v2987_v44 = vpack.i.bf16 %v2039_v38, %v2037_v27  ;;  %v2977_v39 = vpack.i.bf16 %v3845_v34, %v3825_v35 }
 0x15b   : > { %2983 = vrot.lane.b32.xlu0 %v2982_v61, %s3094_s25  ;;  %v1100_v37 = vpop.f32.mrf.mxu0  ;;  %v3856_v60 = vsel %vm3818_vm11, 0.0, %v3409_v24  ;;  %v1932_v48 = vrot.slane %v3757_v36, 1  ;;  %v2040_v4 = vrot.slane %v3831_v25, 2  ;;  %v1935_v46 = vrot.slane %v3836_v33, 1  ;;  %v3030_v7 = vld [vmem:[%s3209_s22 + $0x18] sm:$0xf] }
 0x15c   : > { %1503 = vst [vmem:[#allocation1 + $0x20] ss:$4 sm:$0xff] %v1268_v9  ;;  %v3862_v53 = vsel %vm1343_vm2, 0.0, %v1498_v21  ;;  %v1929_v2 = vrot.slane %v3831_v25, 1  ;;  %v1930_v24 = vrot.slane %v3795_v41, 1  ;;  %v2947_v55 = vpack.i.bf16 %v2064_v1, %v2062_v57 }
 0x15d   : > { %v2042_v36 = vsel %vm2019_vm12, %v2040_v4, %v2041_v12  ;;  %v1934_v22 = vrot.slane %v3856_v60, 1  ;;  %v3872_v28 = vsel %vm1908_vm1, %v1935_v46, %v1937_v43  ;;  %v1954_v61 = vrot.slane %v3862_v53, 1  ;;  %v3031_v43 = vld [vmem:[%s3209_s22 + $0x1c] sm:$0xf]  ;;  %v3040_v35 = vld [vmem:[%s3209_s22 + $0x64] sm:$0xf] }
 0x15e   : > { %v2997_v5 = vpack.i.bf16 %v2044_v49, %v2042_v36  ;;  %v2065_v29 = vrot.slane %v3862_v53, 2  ;;  %v3887_v42 = vsel %vm1908_vm1, %v1930_v24, %v1932_v48  ;;  %vm1566_vm13 = vsmask.f32 3328  ;;  %v3032_v48 = vld [vmem:[%s3209_s22 + $0x20] sm:$0x1] }
 0x15f   : > { %2973 = vrot.lane.b32.xlu1 %v2972_v26, %s3094_s25  ;;  %v3891_v6 = vsel %vm1908_vm1, %v1934_v22, %v1935_v46  ;;  %v1590_v10 = vshrl.u32 %v3030_v7, 16  ;;  %v1787_v56 = vsel %vm1030_vm0, %v1737_v3, 0  ;;  %vm1567_vm3 = vsmask.f32 7440  ;;  %v3033_v36 = vld [vmem:[%s3209_s22 + $0x54] sm:$0xf] }
 0x160   : > { %v3002_v62 = vpack.i.bf16 %v3872_v28, %v3891_v6  ;;  %2876 = vmatpush.bf16.msra.mxu1 %v1787_v56  ;;  %v1593_v21 = vshll.u32 %v3030_v7, 16  ;;  %2877 = vmatpush.bf16.msra.mxu3 %v1787_v56  ;;  %v1598_v57 = vshll.u32 %v3031_v43, 16  ;;  %v1602_v1 = vshrl.u32 %v3031_v43, 16  ;;  %vm3931_vm0 = vmor %vm1566_vm13, %vm1567_vm3  ;;  %v3036_v43 = vld [vmem:[%s3209_s22 + $0x24] sm:$0xf] }
 0x161   : > { %v1504_v59 = vld.sshfl [vmem:[#allocation1] sm:$0xff pattern:$0x73625140]  ;;  %v1592_v20 = vrot.slane %v1590_v10, 4  ;;  %1796 = vmatpush.bf16.msrb.mxu0 %v1787_v56  ;;  %v1607_v4 = vshll.u32 %v3032_v48, 16  ;;  %v1698_v22 = vshll.u32 %v3033_v36, 16 }
 0x162   : > { %2948 = vrot.lane.b32.xlu2 %v2947_v55, %s3095_s18  ;;  %v3895_v47 = vsel %vm3800_vm15, 0.0, %v1504_v59  ;;  %v1595_v38 = vrot.slane %v1593_v21, 5  ;;  %v1695_v55 = vshrl.u32 %v3033_v36, 16  ;;  %v1604_v7 = vrot.slane %v1602_v1, 4  ;;  %v3034_v56 = vld [vmem:[%s3209_s22 + $0x58] sm:$0xf] }
 0x163   : > { %2998 = vrot.lane.b32.xlu0 %v2997_v5, %s3095_s18  ;;  %v1505_v16 = vld.sshfl [vmem:[#allocation1 + $0x20] sm:$0xff pattern:$0x73625140]  ;;  %v1955_v0 = vrot.slane %v3895_v47, 1  ;;  %v2066_v11 = vrot.slane %v3895_v47, 2  ;;  %v1609_v10 = vrot.slane %v1607_v4, 5 }
 0x164   : > { %v1565_v9 = vsel %vm3878_vm9, 0.0, %v1505_v16  ;;  %v1596_v59 = vor.u32 %v1595_v38, %v1592_v20  ;;  %v1697_v16 = vrot.slane %v1695_v55, 4  ;;  %v1707_v20 = vshrl.u32 %v3034_v56, 16  ;;  %v3035_v21 = vld [vmem:[%s3209_s22 + $0x5c] sm:$0x1] }
 0x165   : > { %v1956_v26 = vsel %vm1908_vm1, %v1954_v61, %v1955_v0  ;;  %v1957_v37 = vrot.slane %v1565_v9, 1  ;;  %v3911_v12 = vsel %vm2019_vm12, %v2065_v29, %v2066_v11  ;;  %v2068_v27 = vrot.slane %v1565_v9, 2  ;;  %v2874_v29 = vld [vmem:[%s4415_s4 + $0x8] sm:$0x30] }
 0x166   : > { %v1600_v61 = vrot.slane %v1598_v57, 5  ;;  %v1703_v9 = vshll.u32 %v3034_v56, 16  ;;  %v1611_v57 = vshrl.u32 %v3036_v43, 16  ;;  %v1709_v23 = vrot.slane %v1707_v20, 4 }
 0x167   : > { %2988 = vrot.lane.b32.xlu1 %v2987_v44, %s3095_s18  ;;  %v1958_v49 = vsel %vm1908_vm1, %v1955_v0, %v1957_v37  ;;  %v3918_v46 = vsel %vm2019_vm12, %v2066_v11, %v2068_v27  ;;  %v2826_v44 = vld [vmem:[%s4415_s4 + $0x8] sm:$0xf]  ;;  %v1700_v0 = vrot.slane %v1698_v22, 5  ;;  %v1597_v11 = vrot.slane %v1596_v59, 4 }
 0x168   : > { %v3012_v5 = vpack.i.bf16 %v1958_v49, %v1956_v26  ;;  %v3017_v58 = vpack.i.bf16 %v3918_v46, %v3911_v12  ;;  %v1712_v26 = vshll.u32 %v3035_v21, 16  ;;  %v1605_v37 = vor.u32 %v1604_v7, %v1600_v61  ;;  %v3037_v59 = vld [vmem:[%s3209_s22 + $0x28] sm:$0xf] }
 0x169   : > { %v1701_v27 = vor.u32 %v1700_v0, %v1697_v16  ;;  %v2827_v38 = vor.u32 %v2874_v29, %v2826_v44  ;;  %v1601_v1 = vsel %vm3931_vm0, %v1597_v11, %v1600_v61  ;;  %v1705_v48 = vrot.slane %v1703_v9, 5  ;;  %v3038_v16 = vld [vmem:[%s3209_s22 + $0x2c] sm:$0x1] }
 0x16a   : > { %2963 = vrot.lane.b32.xlu2 %v2962_v52, %s3095_s18  ;;  %v1714_v30 = vrot.slane %v1712_v26, 5  ;;  %v1606_v52 = vrot.slane %v1605_v37, 4  ;;  %v1740_v4 = vunpack.c.l.b16 %v1601_v1  ;;  %v1613_v22 = vrot.slane %v1611_v57, 4  ;;  %v2875_v57 = vld [vmem:[%s4415_s4 + $0x10] sm:$0x30] }
 0x16b   : > { %3013 = vrot.lane.b32.xlu0 %v3012_v5, %s3094_s25  ;;  %v1702_v49 = vrot.slane %v1701_v27, 4  ;;  %v2267_v36 = vsel %vm2019_vm12, %v2827_v38, 0  ;;  %v1710_v55 = vor.u32 %v1709_v23, %v1705_v48  ;;  %v1614_v5 = vshll.u32 %v3036_v43, 16  ;;  %v3039_v27 = vld [vmem:[%s3209_s22 + $0x60] sm:$0xf] }
 0x16c   : > { %2878 = vmatpush.bf16.msrb.mxu3 %v2267_v36  ;;  %v1619_v44 = vshll.u32 %v3037_v59, 16  ;;  %2276 = vmatpush.bf16.msra.mxu2 %v2267_v36  ;;  %v1610_v61 = vsel %vm3931_vm0, %v1606_v52, %v1609_v10  ;;  %v1623_v7 = vshrl.u32 %v3037_v59, 16  ;;  %v1628_v0 = vshll.u32 %v3038_v16, 16  ;;  %v2852_v43 = vld [vmem:[%s4415_s4 + $0x10] sm:$0xf] }
 0x16d   : > { %v1706_v29 = vsel %vm3931_vm0, %v1702_v49, %v1705_v48  ;;  %v1741_v11 = vunpack.c.l.b16 %v1610_v61  ;;  %v1711_v56 = vrot.slane %v1710_v55, 4  ;;  %v1616_v20 = vrot.slane %v1614_v5, 5 }
 0x16e   : > { %v1750_v9 = vunpack.c.l.b16 %v1706_v29  ;;  %v1621_v21 = vrot.slane %v1619_v44, 5  ;;  %v1625_v26 = vrot.slane %v1623_v7, 4  ;;  %v1630_v37 = vrot.slane %v1628_v0, 5 }
 0x16f   : > { %3003 = vrot.lane.b32.xlu1 %v3002_v62, %s3094_s25  ;;  %v1716_v28 = vshrl.u32 %v3039_v27, 16  ;;  %v1755_v6 = vpack.c.b16 %v1741_v11, %v1740_v4  ;;  %v1715_v62 = vsel %vm3931_vm0, %v1711_v56, %v1714_v30  ;;  %v1617_v10 = vor.u32 %v1616_v20, %v1613_v22  ;;  %v3041_v4 = vld [vmem:[%s3209_s22 + $0x68] sm:$0x1] }
 0x170   : > { %v1719_v38 = vshll.u32 %v3039_v27, 16  ;;  %v1751_v1 = vunpack.c.l.b16 %v1715_v62  ;;  %v1626_v48 = vor.u32 %v1625_v26, %v1621_v21  ;;  %v1724_v34 = vshll.u32 %v3040_v35, 16 }
 0x171   : > { %v1718_v23 = vrot.slane %v1716_v28, 4  ;;  %2815 = vmatmul.msk.bf16.vlgmr.msra.gmra.mxu1 %vm1005_vm5, %v1755_v6  ;;  %v1728_v30 = vshrl.u32 %v3040_v35, 16  ;;  %v1733_v49 = vshll.u32 %v3041_v4, 16  ;;  %v2853_v5 = vor.u32 %v2875_v57, %v2852_v43  ;;  %v3043_v57 = vld [vmem:[%s3209_s22 + $0x34] sm:$0xf] }
 0x172   : > { %2978 = vrot.lane.b32.xlu2 %v2977_v39, %s3095_s18  ;;  %v1618_v39 = vrot.slane %v1617_v10, 4  ;;  %v1721_v52 = vrot.slane %v1719_v38, 5  ;;  %v1760_v36 = vpack.c.b16 %v1751_v1, %v1750_v9  ;;  %v1627_v55 = vrot.slane %v1626_v48, 4  ;;  %v3042_v10 = vld [vmem:[%s3209_s22 + $0x30] sm:$0xf] }
 0x173   : > { %v1726_v22 = vrot.slane %v1724_v34, 5  ;;  %v1730_v44 = vrot.slane %v1728_v30, 4  ;;  %v1931_v61 = vsel %vm1908_vm1, %v1929_v2, %v1930_v24  ;;  %v2400_v29 = vsel %vm2019_vm12, %v2853_v5, 0 }
 0x174   : > { %v1722_v59 = vor.u32 %v1721_v52, %v1718_v23  ;;  %2820 = vmatmul.msk.bf16.vlgmr.msra.gmra.mxu3 %vm1005_vm5, %v1760_v36  ;;  %v2992_v7 = vpack.i.bf16 %v3887_v42, %v1931_v61  ;;  %v1735_v11 = vrot.slane %v1733_v49, 5  ;;  %2409 = vmatpush.bf16.msrb.mxu1 %v2400_v29  ;;  %v2048_v56 = vrot.slane %v3809_v18, 2  ;;  %v3044_v23 = vld [vmem:[%s3209_s22 + $0x38] sm:$0x1] }
 0x175   : > { %v1731_v0 = vor.u32 %v1730_v44, %v1726_v22  ;;  %v1622_v12 = vsel %vm3931_vm0, %v1618_v39, %v1621_v21  ;;  %v1631_v46 = vsel %vm3931_vm0, %v1627_v55, %v1630_v37  ;;  %v2046_v24 = vrot.slane %v3836_v33, 2 }
 0x176   : > { %v1723_v16 = vrot.slane %v1722_v59, 4  ;;  %v1743_v42 = vunpack.c.l.b16 %v1631_v46  ;;  %v2045_v20 = vrot.slane %v3856_v60, 2  ;;  %v1632_v38 = vshrl.u32 %v3042_v10, 16  ;;  %v3046_v46 = vld [vmem:[%s3209_s22 + $0x40] sm:$0xf] }
 0x177   : > { %3018 = vrot.lane.b32.xlu1 %v3017_v58, %s3095_s18  ;;  %v1732_v2 = vrot.slane %v1731_v0, 4  ;;  %v1742_v58 = vunpack.c.l.b16 %v1622_v12  ;;  %v2049_v21 = vsel %vm2019_vm12, %v2046_v24, %v2048_v56  ;;  %v1635_v43 = vshll.u32 %v3042_v10, 16  ;;  %v3045_v0 = vld [vmem:[%s3209_s22 + $0x3c] sm:$0xf] }
 0x178   : > { %v1727_v9 = vsel %vm3931_vm0, %v1723_v16, %v1726_v22  ;;  %v2047_v26 = vsel %vm2019_vm12, %v2045_v20, %v2046_v24  ;;  %v1640_v1 = vshll.u32 %v3043_v57, 16  ;;  %v1644_v48 = vshrl.u32 %v3043_v57, 16  ;;  %v2873_v16 = vld [vmem:[%s4415_s4] sm:$0x30] }
 0x179   : > { %v1736_v18 = vsel %vm3931_vm0, %v1732_v2, %v1735_v11  ;;  %v1752_v37 = vunpack.c.l.b16 %v1727_v9  ;;  %v3007_v28 = vpack.i.bf16 %v2049_v21, %v2047_v26  ;;  %v1756_v6 = vpack.c.b16 %v1743_v42, %v1742_v58  ;;  %v3047_v42 = vld [vmem:[%s3209_s22 + $0x44] sm:$0x1] }
 0x17a   : > { %2993 = vrot.lane.b32.xlu2 %v2992_v7, %s3094_s25  ;;  %v1753_v27 = vunpack.c.l.b16 %v1736_v18  ;;  %v1649_v35 = vshll.u32 %v3044_v23, 16  ;;  %v1634_v34 = vrot.slane %v1632_v38, 4  ;;  %v1637_v39 = vrot.slane %v1635_v43, 5  ;;  %v2838_v7 = vld [vmem:[%s4415_s4] sm:$0xf]  ;;  %s462_s25 = sadd.s32 %s2797_s24, %s2796_s23 }
 0x17b   : > { %v1642_v52 = vrot.slane %v1640_v1, 5  ;;  %v1646_v30 = vrot.slane %v1644_v48, 4  ;;  %v1653_v11 = vshrl.u32 %v3045_v0, 16  ;;  %v2839_v56 = vor.u32 %v2873_v16, %v2838_v7  ;;  %v3048_v23 = vld [vmem:[%s3209_s22 + $0x48] sm:$0xf]  ;;  %s2798_s26 = sshll.u32 %s462_s25, 3 }
 0x17c   : > { %v1761_v62 = vpack.c.b16 %v1753_v27, %v1752_v37  ;;  %v1638_v4 = vor.u32 %v1637_v39, %v1634_v34  ;;  %v1651_v36 = vrot.slane %v1649_v35, 5  ;;  %v1656_v12 = vshll.u32 %v3045_v0, 16  ;;  %v3049_v39 = vld [vmem:[%s3209_s22 + $0x4c] sm:$0xf]  ;;  %s4289_s15 = scalar_lea.vmem %s4424_s13, %s2798_s26 }
 0x17d   : > { %v1647_v49 = vor.u32 %v1646_v30, %v1642_v52  ;;  %v1661_v2 = vshll.u32 %v3046_v46, 16  ;;  %v1665_v24 = vshrl.u32 %v3046_v46, 16  ;;  %v1655_v58 = vrot.slane %v1653_v11, 4 }
 0x17e   : > { %v1639_v55 = vrot.slane %v1638_v4, 4  ;;  %v1670_v9 = vshll.u32 %v3047_v42, 16  ;;  %v2332_v18 = vsel %vm2019_vm12, %v2839_v56, 0  ;;  %v1658_v20 = vrot.slane %v1656_v12, 5  ;;  %v3050_v4 = vld [vmem:[%s3209_s22 + $0x50] sm:$0x1] }
 0x17f   : > { %v1648_v22 = vrot.slane %v1647_v49, 4  ;;  %v1663_v21 = vrot.slane %v1661_v2, 5  ;;  %v1667_v26 = vrot.slane %v1665_v24, 4  ;;  %2341 = vmatpush.bf16.msra.mxu3 %v2332_v18  ;;  %v1674_v35 = vshrl.u32 %v3048_v23, 16 }
 0x180   : > { %v1643_v5 = vsel %vm3931_vm0, %v1639_v55, %v1642_v52  ;;  %v1659_v37 = vor.u32 %v1658_v20, %v1655_v58  ;;  %v1677_v34 = vshll.u32 %v3048_v23, 16  ;;  %v1682_v52 = vshll.u32 %v3049_v39, 16 }
 0x181   : > { %2816 = vmatmul.msk.bf16.gmra.mxu1 %vm1005_vm5, %v1756_v6  ;;  %v1652_v59 = vsel %vm3931_vm0, %v1648_v22, %v1651_v36  ;;  %v1744_v44 = vunpack.c.l.b16 %v1643_v5  ;;  %v1668_v27 = vor.u32 %v1667_v26, %v1663_v21  ;;  %v1686_v30 = vshrl.u32 %v3049_v39, 16 }
 0x182   : > { %3008 = vrot.lane.b32.xlu2 %v3007_v28, %s3095_s18  ;;  %v1745_v61 = vunpack.c.l.b16 %v1652_v59  ;;  %v1672_v28 = vrot.slane %v1670_v9, 5  ;;  %v1660_v6 = vrot.slane %v1659_v37, 4  ;;  %v1691_v49 = vshll.u32 %v3050_v4, 16 }
 0x183   : > { %v1676_v36 = vrot.slane %v1674_v35, 4  ;;  %v1679_v55 = vrot.slane %v1677_v34, 5  ;;  %v1684_v59 = vrot.slane %v1682_v52, 5  ;;  %vm2130_vm1 = vcmask 31744  }
 0x184   : > { %2821 = vmatmul.msk.bf16.gmra.mxu3 %vm1005_vm5, %v1761_v62  ;;  %v1757_v29 = vpack.c.b16 %v1745_v61, %v1744_v44  ;;  %v1669_v62 = vrot.slane %v1668_v27, 4  ;;  %v1664_v10 = vsel %vm3931_vm0, %v1660_v6, %v1663_v21  ;;  %v1688_v44 = vrot.slane %v1686_v30, 4 }
 0x185   : > { %v1746_v43 = vunpack.c.l.b16 %v1664_v10  ;;  %v1693_v0 = vrot.slane %v1691_v49, 5  ;;  %vm2241_vm12 = vcmask 97280   ;;  %vm2556_vm6 = vcmask 1041408  }
 0x186   : > { %v1673_v38 = vsel %vm3931_vm0, %v1669_v62, %v1672_v28  ;;  %v1689_v16 = vor.u32 %v1688_v44, %v1684_v59 }
 0x187   : > { %v1747_v57 = vunpack.c.l.b16 %v1673_v38 }
 0x188   : > { %v1690_v24 = vrot.slane %v1689_v16, 4 }
 0x189   : > { %v1758_v1 = vpack.c.b16 %v1747_v57, %v1746_v43 }
 0x18a   : > { %v1694_v26 = vsel %vm3931_vm0, %v1690_v24, %v1693_v0 }
 0x18b   : > { %v1749_v27 = vunpack.c.l.b16 %v1694_v26 }
 0x191   : > { %2817 = vmatmul.msk.bf16.gmra.mxu1 %vm1005_vm5, %v1757_v29  ;;  %v1680_v29 = vor.u32 %v1679_v55, %v1676_v36 }
 0x193   : > { %v1681_v12 = vrot.slane %v1680_v29, 4 }
 0x195   : > { %v1685_v9 = vsel %vm3931_vm0, %v1681_v12, %v1684_v59 }
 0x196   : > { %v1748_v37 = vunpack.c.l.b16 %v1685_v9 }
 0x198   : > { %v1759_v6 = vpack.c.b16 %v1749_v27, %v1748_v37 }
 0x1a1   : > { %2818 = vmatmul.msk.bf16.gmra.mxu1 %vm1005_vm5, %v1758_v1 }
 0x1ad   : > { %v2924_v48 = vpop.permute.xlu0 %2923 }
 0x1ae   : > { %v2926_v22 = vunpack.i.h.bf16 %v2924_v48  ;;  %v2925_v5 = vunpack.i.l.bf16 %v2924_v48 }
 0x1b0   : > { %v2144_v46 = vsel %vm2130_vm1, %v3450_v8, %v2926_v22  ;;  %v2143_v2 = vsel %vm2130_vm1, %v3454_v15, %v2925_v5 }
 0x1b1   : > { %2819 = vmatmul.msk.bf16.gmra.mxu1 %vm1005_vm5, %v1759_v6 }
 0x1b4   : > { %v4027_v61 = vpop.permute.xlu2 %2943 }
 0x1b5   : > { %v2929_v7 = vpop.permute.xlu0 %2928  ;;  %v2946_v0 = vunpack.i.h.bf16 %v4027_v61 }
 0x1b6   : > { %v2931_v11 = vunpack.i.h.bf16 %v2929_v7  ;;  %v2930_v56 = vunpack.i.l.bf16 %v2929_v7 }
 0x1b8   : > { %v2163_v58 = vsel %vm1005_vm5, %v2143_v2, %v2930_v56  ;;  %v2164_v42 = vsel %vm1005_vm5, %v2144_v46, %v2931_v11 }
 0x1b9   : > { %v2183_v18 = vpack.c.bf16 %v2163_v58, %v2163_v58  ;;  %v2184_v20 = vpack.c.bf16 %v2164_v42, %v2164_v42  ;;  %v2934_v21 = vpop.permute.xlu1 %2933 }
 0x1ba   : > { %v2936_v38 = vunpack.i.h.bf16 %v2934_v21  ;;  %v2935_v43 = vunpack.i.l.bf16 %v2934_v21 }
 0x1bb   : > { %v2222_v8 = vunpack.c.l.b16 %v2183_v18  ;;  %v2223_v28 = vunpack.c.l.b16 %v2184_v20 }
 0x1bc   : > { %v2949_v15 = vpop.permute.xlu2 %2948  ;;  %v2146_v23 = vsel %vm2130_vm1, %v3572_v32, %v2936_v38  ;;  %v2145_v35 = vsel %vm2130_vm1, %v3550_v19, %v2935_v43  ;;  %v2945_v19 = vunpack.i.l.bf16 %v4027_v61 }
 0x1bd   : > { %v4039_v62 = vpack.c.b16 %v2223_v28, %v2222_v8  ;;  %v4041_v10 = vpop.permute.xlu0 %2953  ;;  %v2950_v11 = vunpack.i.l.bf16 %v2949_v15  ;;  %v2951_v46 = vunpack.i.h.bf16 %v2949_v15 }
 0x1be   : > { %v2147_v58 = vsel %vm2130_vm1, %v3704_v63, %v2945_v19 }
 0x1bf   : > { %2833 = vmatmul.msk.bf16.vlgmr.msrb.gmra.mxu3 %vm2241_vm12, %v4039_v62  ;;  %v2167_v61 = vsel %vm1005_vm5, %v2147_v58, %v2950_v11 }
 0x1c0   : > { %v2187_v6 = vpack.c.bf16 %v2167_v61, %v2167_v61 }
 0x1c1   : > { %v2939_v57 = vpop.permute.xlu1 %2938 }
 0x1c2   : > { %v2941_v1 = vunpack.i.h.bf16 %v2939_v57  ;;  %v2940_v48 = vunpack.i.l.bf16 %v2939_v57 }
 0x1c4   : > { %v2165_v34 = vsel %vm1005_vm5, %v2145_v35, %v2940_v48  ;;  %v2166_v39 = vsel %vm1005_vm5, %v2146_v23, %v2941_v1  ;;  %v4052_v4 = vpop.permute.xlu2 %2963 }
 0x1c5   : > { %v2185_v52 = vpack.c.bf16 %v2165_v34, %v2165_v34  ;;  %v2186_v30 = vpack.c.bf16 %v2166_v39, %v2166_v39  ;;  %v2969_v55 = vpop.permute.xlu0 %2968  ;;  %v2226_v34 = vunpack.c.l.b16 %v2187_v6 }
 0x1c6   : > { %v2971_v44 = vunpack.i.h.bf16 %v2969_v55  ;;  %v2970_v29 = vunpack.i.l.bf16 %v2969_v55  ;;  %v2955_v55 = vunpack.i.l.bf16 %v4041_v10 }
 0x1c7   : > { %v2224_v49 = vunpack.c.l.b16 %v2185_v52  ;;  %v2225_v36 = vunpack.c.l.b16 %v2186_v30 }
 0x1c9   : > { %v2959_v22 = vpop.permute.xlu1 %2958  ;;  %v4054_v32 = vpack.c.b16 %v2225_v36, %v2224_v49  ;;  %v2956_v36 = vunpack.i.h.bf16 %v4041_v10 }
 0x1ca   : > { %v2961_v5 = vunpack.i.h.bf16 %v2959_v22  ;;  %v2960_v59 = vunpack.i.l.bf16 %v2959_v22 }
 0x1cb   : > { %v2132_v10 = vsel %vm2130_vm1, %v3475_v31, %v2956_v36 }
 0x1cc   : > { %v2134_v7 = vsel %vm2130_vm1, %v3555_v13, %v2961_v5  ;;  %v2133_v16 = vsel %vm2130_vm1, %v3581_v50, %v2960_v59  ;;  %v2979_v13 = vpop.permute.xlu2 %2978  ;;  %v2148_v50 = vsel %vm2130_vm1, %v3721_v45, %v2946_v0  ;;  %v2966_v5 = vunpack.i.h.bf16 %v4052_v4 }
 0x1cd   : > { %v2153_v56 = vsel %vm1005_vm5, %v2133_v16, %v2970_v29  ;;  %v2154_v12 = vsel %vm1005_vm5, %v2134_v7, %v2971_v44  ;;  %v2168_v20 = vsel %vm1005_vm5, %v2148_v50, %v2951_v46  ;;  %v2981_v27 = vunpack.i.h.bf16 %v2979_v13  ;;  %v2984_v1 = vpop.permute.xlu0 %2983 }
 0x1ce   : > { %v2173_v2 = vpack.c.bf16 %v2153_v56, %v2153_v56  ;;  %v2174_v24 = vpack.c.bf16 %v2154_v12, %v2154_v12  ;;  %v2980_v8 = vunpack.i.l.bf16 %v2979_v13  ;;  %v2188_v38 = vpack.c.bf16 %v2168_v20, %v2168_v20 }
 0x1cf   : > { %2834 = vmatmul.msk.bf16.gmra.mxu3 %vm2241_vm12, %v4054_v32  ;;  %v2986_v39 = vunpack.i.h.bf16 %v2984_v1  ;;  %v2985_v52 = vunpack.i.l.bf16 %v2984_v1  ;;  %v2965_v59 = vunpack.i.l.bf16 %v4052_v4  ;;  %v2131_v16 = vsel %vm2130_vm1, %v3488_v40, %v2955_v55 }
 0x1d0   : > { %v2212_v42 = vunpack.c.l.b16 %v2173_v2  ;;  %v2213_v9 = vunpack.c.l.b16 %v2174_v24  ;;  %v2152_v4 = vsel %vm1005_vm5, %v2132_v10, %v2966_v5 }
 0x1d1   : > { %v2974_v18 = vpop.permute.xlu1 %2973  ;;  %v2138_v44 = vsel %vm2130_vm1, %v3690_v54, %v2986_v39  ;;  %v2137_v29 = vsel %vm2130_vm1, %v3680_v51, %v2985_v52  ;;  %v2151_v54 = vsel %vm1005_vm5, %v2131_v16, %v2965_v59  ;;  %v2172_v51 = vpack.c.bf16 %v2152_v4, %v2152_v4 }
 0x1d2   : > { %v2976_v21 = vunpack.i.h.bf16 %v2974_v18  ;;  %v2975_v26 = vunpack.i.l.bf16 %v2974_v18  ;;  %v4072_v37 = vpack.c.b16 %v2213_v9, %v2212_v42  ;;  %v2171_v56 = vpack.c.bf16 %v2151_v54, %v2151_v54 }
 0x1d3   : > { %v2321_v31 = vunpack.c.l.b16 %v2172_v51 }
 0x1d4   : > { %v2136_v63 = vsel %vm2130_vm1, %v3631_v17, %v2976_v21  ;;  %v2135_v28 = vsel %vm2130_vm1, %v3673_v14, %v2975_v26  ;;  %2828 = vmatmul.msk.bf16.vlgmr.msra.gmra.mxu2 %vm2241_vm12, %v4072_v37  ;;  %v2227_v17 = vunpack.c.l.b16 %v2188_v38  ;;  %v2994_v12 = vpop.permute.xlu2 %2993  ;;  %v2320_v13 = vunpack.c.l.b16 %v2171_v56 }
 0x1d5   : > { %v2155_v45 = vsel %vm1005_vm5, %v2135_v28, %v2980_v8  ;;  %v2156_v15 = vsel %vm1005_vm5, %v2136_v63, %v2981_v27  ;;  %v2996_v24 = vunpack.i.h.bf16 %v2994_v12  ;;  %v2995_v58 = vunpack.i.l.bf16 %v2994_v12  ;;  %v2999_v42 = vpop.permute.xlu0 %2998 }
 0x1d6   : > { %v2175_v43 = vpack.c.bf16 %v2155_v45, %v2155_v45  ;;  %v2176_v57 = vpack.c.bf16 %v2156_v15, %v2156_v15  ;;  %v4088_v22 = vpack.c.b16 %v2227_v17, %v2226_v34  ;;  %v2322_v61 = vpack.c.b16 %v2321_v31, %v2320_v13 }
 0x1d7   : > { %v2140_v9 = vsel %vm2130_vm1, %v3795_v41, %v2996_v24  ;;  %v2139_v50 = vsel %vm2130_vm1, %v3831_v25, %v2995_v58  ;;  %v3001_v18 = vunpack.i.h.bf16 %v2999_v42  ;;  %v3000_v20 = vunpack.i.l.bf16 %v2999_v42 }
 0x1d8   : > { %v2214_v48 = vunpack.c.l.b16 %v2175_v43  ;;  %v2215_v23 = vunpack.c.l.b16 %v2176_v57 }
 0x1d9   : > { %v2989_v35 = vpop.permute.xlu1 %2988  ;;  %v2159_v21 = vsel %vm1005_vm5, %v2139_v50, %v3000_v20  ;;  %v2160_v26 = vsel %vm1005_vm5, %v2140_v9, %v3001_v18 }
 0x1da   : > { %v4082_v14 = vpack.c.b16 %v2215_v23, %v2214_v48  ;;  %v2991_v30 = vunpack.i.h.bf16 %v2989_v35  ;;  %v2990_v49 = vunpack.i.l.bf16 %v2989_v35  ;;  %v2179_v27 = vpack.c.bf16 %v2159_v21, %v2159_v21 }
 0x1db   : > { %v2180_v8 = vpack.c.bf16 %v2160_v26, %v2160_v26 }
 0x1dc   : > { %2854 = vmatmul.msk.bf16.vlgmr.msrb.gmra.mxu1 %vm2241_vm12, %v4082_v14  ;;  %v2158_v19 = vsel %vm1005_vm5, %v2138_v44, %v2991_v30  ;;  %v2157_v7 = vsel %vm1005_vm5, %v2137_v29, %v2990_v49  ;;  %v2218_v28 = vunpack.c.l.b16 %v2179_v27  ;;  %v3009_v6 = vpop.permute.xlu2 %3008 }
 0x1dd   : > { %v2177_v0 = vpack.c.bf16 %v2157_v7, %v2157_v7  ;;  %v2178_v11 = vpack.c.bf16 %v2158_v19, %v2158_v19  ;;  %v2219_v25 = vunpack.c.l.b16 %v2180_v8  ;;  %v3011_v1 = vunpack.i.h.bf16 %v3009_v6  ;;  %v3014_v19 = vpop.permute.xlu0 %3013 }
 0x1de   : > { %v3010_v48 = vunpack.i.l.bf16 %v3009_v6  ;;  %v3016_v10 = vunpack.i.h.bf16 %v3014_v19  ;;  %v3015_v16 = vunpack.i.l.bf16 %v3014_v19 }
 0x1df   : > { %2835 = vmatmul.msk.bf16.gmra.mxu3 %vm2241_vm12, %v4088_v22  ;;  %v2216_v46 = vunpack.c.l.b16 %v2177_v0  ;;  %v2217_v2 = vunpack.c.l.b16 %v2178_v11  ;;  %v2231_v38 = vpack.c.b16 %v2219_v25, %v2218_v28  ;;  %v3052_v28 = vld [vmem:[%s3209_s22 + $0x10] sm:$0xf] }
 0x1e0   : > { %v2150_v51 = vsel %vm2130_vm1, %v3895_v47, %v3016_v10  ;;  %v2149_v56 = vsel %vm2130_vm1, %v3862_v53, %v3015_v16  ;;  %v1577_v25 = vshll.u32 %v3052_v28, 16 }
 0x1e1   : > { %v2230_v40 = vpack.c.b16 %v2217_v2, %v2216_v46  ;;  %v3004_v63 = vpop.permute.xlu1 %3003 }
 0x1e2   : > { %v3006_v45 = vunpack.i.h.bf16 %v3004_v63  ;;  %v3005_v15 = vunpack.i.l.bf16 %v3004_v63 }
 0x1e4   : > { %2829 = vmatmul.msk.bf16.gmra.mxu2 %vm2241_vm12, %v4082_v14  ;;  %v2142_v43 = vsel %vm2130_vm1, %v3836_v33, %v3006_v45  ;;  %v2141_v57 = vsel %vm2130_vm1, %v3856_v60, %v3005_v15  ;;  %v1581_v45 = vshrl.u32 %v3052_v28, 16  ;;  %v3053_v15 = vld [vmem:[%s3209_s22 + $0x14] sm:$0x1] }
 0x1e5   : > { %v2161_v23 = vsel %vm1005_vm5, %v2141_v57, %v3010_v48  ;;  %v2162_v35 = vsel %vm1005_vm5, %v2142_v43, %v3011_v1  ;;  %v1586_v6 = vshll.u32 %v3053_v15, 16  ;;  %v1579_v57 = vrot.slane %v1577_v25, 5 }
 0x1e6   : > { %v2181_v17 = vpack.c.bf16 %v2161_v23, %v2161_v23  ;;  %v2182_v39 = vpack.c.bf16 %v2162_v35, %v2162_v35  ;;  %v1583_v1 = vrot.slane %v1581_v45, 4 }
 0x1e8   : > { %v2220_v33 = vunpack.c.l.b16 %v2181_v17  ;;  %v2221_v52 = vunpack.c.l.b16 %v2182_v39  ;;  %v1584_v17 = vor.u32 %v1583_v1, %v1579_v57  ;;  %v1588_v39 = vrot.slane %v1586_v6, 5 }
 0x1e9   : > { %v3019_v7 = vpop.permute.xlu1 %3018 }
 0x1ea   : > { %v2232_v30 = vpack.c.b16 %v2221_v52, %v2220_v33  ;;  %v3021_v54 = vunpack.i.h.bf16 %v3019_v7  ;;  %v3020_v0 = vunpack.i.l.bf16 %v3019_v7 }
 0x1ec   : > { %2855 = vmatmul.msk.bf16.gmra.mxu1 %vm2241_vm12, %v2230_v40  ;;  %v2169_v12 = vsel %vm1005_vm5, %v2149_v56, %v3020_v0  ;;  %v2170_v46 = vsel %vm1005_vm5, %v2150_v51, %v3021_v54  ;;  %v4210_v56 = vld [vmem:[%s4417_s6] ss:$0 sm:$0xff] }
 0x1ed   : > { %v2189_v2 = vpack.c.bf16 %v2169_v12, %v2169_v12  ;;  %v2190_v24 = vpack.c.bf16 %v2170_v46, %v2170_v46 }
 0x1ee   : > { %v4117_v41 = vpop.f32.mrf.mxu1 }
 0x1ef   : > { %2840 = vmatmul.msk.bf16.vlgmr.msra.gmra.mxu3 %vm2241_vm12, %v2322_v61  ;;  %v2388_v13 = vunpack.c.l.b16 %v2189_v2 }
 0x1f4   : > { %2830 = vmatmul.msk.bf16.gmra.mxu2 %vm2241_vm12, %v2230_v40 }
 0x1f6   : > { %v4128_v34 = vpop.f32.mrf.mxu1 }
 0x1f7   : > { %v4142_v55 = vpop.f32.mrf.mxu3 }
 0x1fc   : > { %2856 = vmatmul.msk.bf16.gmra.mxu1 %vm2241_vm12, %v2231_v38 }
 0x1fe   : > { %v4131_v60 = vpop.f32.mrf.mxu1 }
 0x1ff   : > { %2841 = vmatmul.msk.bf16.gmra.mxu3 %vm2241_vm12, %v4072_v37  ;;  %v2531_v37 = vld [vmem:[%s4418_s7] sm:$0x3] }
 0x200   : > { %v2558_v49 = vsel %vm2556_vm6, %v2531_v37, 0 }
 0x201   : > { %2567 = vmatpush.bf16.msrb.mxu2 %v2558_v49  ;;  %v4200_v49 = vld [vmem:[%s4416_s5] ss:$0 sm:$0xff] }
 0x204   : > { %2831 = vmatmul.msk.bf16.gmra.mxu2 %vm2241_vm12, %v2231_v38 }
 0x206   : > { %v4139_v36 = vpop.f32.mrf.mxu1 }
 0x20c   : > { %2857 = vmatmul.msk.bf16.gmra.mxu1 %vm2241_vm12, %v2232_v30 }
 0x20e   : > { %v4146_v5 = vpop.f32.mrf.mxu1 }
 0x20f   : > { %2842 = vmatmul.msk.bf16.gmra.mxu3 %vm2241_vm12, %v4082_v14  ;;  %v4149_v14 = vpop.f32.mrf.mxu3 }
 0x214   : > { %2832 = vmatmul.msk.bf16.gmra.mxu2 %vm2241_vm12, %v2232_v30 }
 0x216   : > { %v4151_v59 = vpop.f32.mrf.mxu1 }
 0x217   : > { %v4156_v44 = vpop.f32.mrf.mxu3 }
 0x21c   : > { %2858 = vmatmul.msk.bf16.gmra.mxu1 %vm2241_vm12, %v4039_v62 }
 0x21e   : > { %v4158_v29 = vpop.f32.mrf.mxu1 }
 0x21f   : > { %2843 = vmatmul.msk.bf16.gmra.mxu3 %vm2241_vm12, %v2230_v40  ;;  %v4160_v4 = vpop.f32.mrf.mxu3 }
 0x226   : > { %v4162_v11 = vpop.f32.mrf.mxu1 }
 0x22c   : > { %2859 = vmatmul.msk.bf16.gmra.mxu1 %vm2241_vm12, %v4054_v32 }
 0x22e   : > { %v4175_v31 = vpop.f32.mrf.mxu1 }
 0x22f   : > { %2844 = vmatmul.msk.bf16.gmra.mxu3 %vm2241_vm12, %v2231_v38 }
 0x236   : > { %v4182_v53 = vpop.f32.mrf.mxu1 }
 0x23c   : > { %2860 = vmatmul.msk.bf16.gmra.mxu1 %vm2241_vm12, %v4088_v22  ;;  %v2389_v22 = vunpack.c.l.b16 %v2190_v24 }
 0x23e   : > { %v2390_v47 = vpack.c.b16 %v2389_v22, %v2388_v13 }
 0x23f   : > { %2845 = vmatmul.msk.bf16.gmra.mxu3 %vm2241_vm12, %v2232_v30  ;;  %v1585_v30 = vrot.slane %v1584_v17, 4 }
 0x241   : > { %v1589_v7 = vsel %vm3931_vm0, %v1585_v30, %v1588_v39 }
 0x242   : > { %v4173_v58 = vpop.f32.mrf.mxu3  ;;  %v1739_v16 = vunpack.c.l.b16 %v1589_v7 }
 0x24a   : > { %v4177_v42 = vpop.f32.mrf.mxu3 }
 0x24c   : > { %2861 = vmatmul.msk.bf16.gmra.mxu1 %vm2241_vm12, %v2390_v47 }
 0x24f   : > { %2846 = vmatmul.msk.bf16.gmra.mxu3 %vm2241_vm12, %v4039_v62  ;;  %v3051_v62 = vld [vmem:[%s3209_s22 + $0xc] sm:$0xf] }
 0x250   : > { %v1569_v8 = vshrl.u32 %v3051_v62, 16  ;;  %v1572_v63 = vshll.u32 %v3051_v62, 16 }
 0x252   : > { %v4184_v40 = vpop.f32.mrf.mxu3  ;;  %v1571_v38 = vrot.slane %v1569_v8, 4  ;;  %v1574_v43 = vrot.slane %v1572_v63, 5 }
 0x254   : > { %v1575_v35 = vor.u32 %v1574_v43, %v1571_v38 }
 0x256   : > { %v1576_v52 = vrot.slane %v1575_v35, 4 }
 0x257   : > { %v2278_v61 = vpop.f32.mrf.mxu2 }
 0x258   : > { %v1580_v19 = vsel %vm3931_vm0, %v1576_v52, %v1579_v57 }
 0x259   : > { %v2411_v9 = vpop.f32.mrf.mxu1  ;;  %v1738_v10 = vunpack.c.l.b16 %v1580_v19 }
 0x25a   : > { %v4186_v50 = vpop.f32.mrf.mxu3 }
 0x25b   : > { %v1754_v0 = vpack.c.b16 %v1739_v16, %v1738_v10 }
 0x25d   : > { %2814 = vmatmul.msk.bf16.vlgmr.msrb.gmra.mxu0 %vm1005_vm5, %v1754_v0 }
 0x25f   : > { %2847 = vmatmul.msk.bf16.gmra.mxu3 %vm2241_vm12, %v4054_v32  ;;  %v2280_v21 = vpop.f32.mrf.mxu2 }
 0x261   : > { %v2413_v18 = vpop.f32.mrf.mxu1 }
 0x262   : > { %v4190_v20 = vpop.f32.mrf.mxu3 }
 0x267   : > { %v2283_v48 = vpop.f32.mrf.mxu2 }
 0x269   : > { %v2416_v27 = vpop.f32.mrf.mxu1 }
 0x26a   : > { %v4192_v26 = vpop.f32.mrf.mxu3 }
 0x26f   : > { %v2285_v46 = vpop.f32.mrf.mxu2 }
 0x271   : > { %v2418_v33 = vpop.f32.mrf.mxu1 }
 0x272   : > { %v2343_v32 = vpop.f32.mrf.mxu3 }
 0x273   : > { %v2344_v23 = vadd.f32 %v2343_v32, %v2278_v61 }
 0x275   : > { %v2451_v37 = vadd.f32 %v2411_v9, %v2344_v23 }
 0x277   : > { %v2471_v51 = vmul.f32 %v4200_v49, %v2451_v37  ;;  %v2288_v63 = vpop.f32.mrf.mxu2 }
 0x279   : > { %v2421_v24 = vpop.f32.mrf.mxu1  ;;  %v2491_v3 = vadd.f32 %v4210_v56, %v2471_v51 }
 0x27a   : > { %v2345_v54 = vpop.f32.mrf.mxu3 }
 0x27b   : > { %v2346_v12 = vadd.f32 %v2345_v54, %v2280_v21  ;;  %v2507_v9 = vmax.f32 %v2491_v3, 0.0 }
 0x27d   : > { %v2452_v2 = vadd.f32 %v2413_v18, %v2346_v12 }
 0x27f   : > { %v2472_v13 = vmul.f32 %v4200_v49, %v2452_v2  ;;  %v2290_v43 = vpop.f32.mrf.mxu2 }
 0x281   : > { %v2492_v22 = vadd.f32 %v4210_v56, %v2472_v13  ;;  %v2423_v21 = vpop.f32.mrf.mxu1 }
 0x282   : > { %v2348_v47 = vpop.f32.mrf.mxu3 }
 0x283   : > { %v2508_v61 = vmax.f32 %v2492_v22, 0.0  ;;  %v2349_v62 = vadd.f32 %v2348_v47, %v2283_v48 }
 0x285   : > { %v2523_v8 = vpack.c.bf16 %v2508_v61, %v2507_v9  ;;  %v2453_v28 = vadd.f32 %v2416_v27, %v2349_v62 }
 0x287   : > { %2862 = vmatmul.msk.bf16.vlgmr.msrb.gmra.mxu2 %vm2130_vm1, %v2523_v8  ;;  %v2473_v18 = vmul.f32 %v4200_v49, %v2453_v28  ;;  %v2293_v52 = vpop.f32.mrf.mxu2 }
 0x289   : > { %v2493_v38 = vadd.f32 %v4210_v56, %v2473_v18  ;;  %v2426_v1 = vpop.f32.mrf.mxu1 }
 0x28a   : > { %v2350_v25 = vpop.f32.mrf.mxu3 }
 0x28b   : > { %v2351_v45 = vadd.f32 %v2350_v25, %v2285_v46  ;;  %v2509_v23 = vmax.f32 %v2493_v38, 0.0 }
 0x28d   : > { %v2454_v15 = vadd.f32 %v2418_v33, %v2351_v45 }
 0x28f   : > { %v2474_v6 = vmul.f32 %v4200_v49, %v2454_v15  ;;  %v2295_v46 = vpop.f32.mrf.mxu2 }
 0x291   : > { %v2494_v57 = vadd.f32 %v4210_v56, %v2474_v6  ;;  %v2428_v37 = vpop.f32.mrf.mxu1 }
 0x292   : > { %v2353_v32 = vpop.f32.mrf.mxu3 }
 0x293   : > { %v2354_v48 = vadd.f32 %v2353_v32, %v2288_v63  ;;  %v2510_v27 = vmax.f32 %v2494_v57, 0.0 }
 0x295   : > { %v2524_v35 = vpack.c.bf16 %v2510_v27, %v2509_v23  ;;  %v2455_v17 = vadd.f32 %v2421_v24, %v2354_v48 }
 0x297   : > { %2863 = vmatmul.msk.bf16.gmra.mxu2 %vm2130_vm1, %v2524_v35  ;;  %v2475_v33 = vmul.f32 %v4200_v49, %v2455_v17  ;;  %v2298_v61 = vpop.f32.mrf.mxu2 }
 0x299   : > { %v2495_v10 = vadd.f32 %v4210_v56, %v2475_v33  ;;  %v2431_v24 = vpop.f32.mrf.mxu1 }
 0x29a   : > { %v2355_v39 = vpop.f32.mrf.mxu3 }
 0x29b   : > { %v2356_v30 = vadd.f32 %v2355_v39, %v2290_v43  ;;  %v2511_v51 = vmax.f32 %v2495_v10, 0.0 }
 0x29d   : > { %v2456_v19 = vadd.f32 %v2423_v21, %v2356_v30 }
 0x29f   : > { %v2476_v7 = vmul.f32 %v4200_v49, %v2456_v19  ;;  %v2300_v38 = vpop.f32.mrf.mxu2 }
 0x2a1   : > { %v2496_v16 = vadd.f32 %v4210_v56, %v2476_v7  ;;  %v2433_v63 = vpop.f32.mrf.mxu1 }
 0x2a2   : > { %v2358_v54 = vpop.f32.mrf.mxu3 }
 0x2a3   : > { %v2359_v0 = vadd.f32 %v2358_v54, %v2293_v52  ;;  %v2512_v12 = vmax.f32 %v2496_v16, 0.0 }
 0x2a5   : > { %v2525_v2 = vpack.c.bf16 %v2512_v12, %v2511_v51  ;;  %v2457_v3 = vadd.f32 %v2426_v1, %v2359_v0 }
 0x2a7   : > { %2864 = vmatmul.msk.bf16.gmra.mxu2 %vm2130_vm1, %v2525_v2  ;;  %v2477_v22 = vmul.f32 %v4200_v49, %v2457_v3 }
 0x2a9   : > { %v2497_v8 = vadd.f32 %v4210_v56, %v2477_v22  ;;  %v2436_v43 = vpop.f32.mrf.mxu1 }
 0x2aa   : > { %v2360_v13 = vpop.f32.mrf.mxu3 }
 0x2ab   : > { %v2361_v47 = vadd.f32 %v2360_v13, %v2295_v46  ;;  %v2513_v18 = vmax.f32 %v2497_v8, 0.0 }
 0x2ad   : > { %v2458_v9 = vadd.f32 %v2428_v37, %v2361_v47 }
 0x2af   : > { %v2478_v62 = vmul.f32 %v4200_v49, %v2458_v9 }
 0x2b1   : > { %v2498_v28 = vadd.f32 %v4210_v56, %v2478_v62  ;;  %v2438_v30 = vpop.f32.mrf.mxu1 }
 0x2b2   : > { %v2363_v21 = vpop.f32.mrf.mxu3 }
 0x2b3   : > { %v2364_v25 = vadd.f32 %v2363_v21, %v2298_v61  ;;  %v2514_v45 = vmax.f32 %v2498_v28, 0.0 }
 0x2b5   : > { %v2526_v15 = vpack.c.bf16 %v2514_v45, %v2513_v18  ;;  %v2459_v6 = vadd.f32 %v2431_v24, %v2364_v25 }
 0x2b7   : > { %2865 = vmatmul.msk.bf16.gmra.mxu2 %vm2130_vm1, %v2526_v15  ;;  %v2479_v1 = vmul.f32 %v4200_v49, %v2459_v6 }
 0x2b9   : > { %v2499_v27 = vadd.f32 %v4210_v56, %v2479_v1  ;;  %v2441_v0 = vpop.f32.mrf.mxu1 }
 0x2ba   : > { %v2365_v57 = vpop.f32.mrf.mxu3 }
 0x2bb   : > { %v2366_v32 = vadd.f32 %v2365_v57, %v2300_v38  ;;  %v2515_v52 = vmax.f32 %v2499_v27, 0.0 }
 0x2bd   : > { %v2460_v48 = vadd.f32 %v2433_v63, %v2366_v32 }
 0x2bf   : > { %v2480_v23 = vmul.f32 %v4200_v49, %v2460_v48 }
 0x2c1   : > { %v2500_v35 = vadd.f32 %v4210_v56, %v2480_v23  ;;  %v2443_v47 = vpop.f32.mrf.mxu1 }
 0x2c2   : > { %v2368_v17 = vpop.f32.mrf.mxu3 }
 0x2c3   : > { %v2369_v39 = vadd.f32 %v2368_v17, %v4173_v58  ;;  %v2516_v33 = vmax.f32 %v2500_v35, 0.0 }
 0x2c5   : > { %v2527_v37 = vpack.c.bf16 %v2516_v33, %v2515_v52  ;;  %v2461_v19 = vadd.f32 %v2436_v43, %v2369_v39  ;;  %v4280_v52 = vld [vmem:[%s4420_s9] ss:$0 sm:$0xff] }
 0x2c7   : > { %2866 = vmatmul.msk.bf16.gmra.mxu2 %vm2130_vm1, %v2527_v37  ;;  %v2481_v10 = vmul.f32 %v4200_v49, %v2461_v19 }
 0x2c9   : > { %v2501_v12 = vadd.f32 %v4210_v56, %v2481_v10 }
 0x2ca   : > { %v2370_v7 = vpop.f32.mrf.mxu3 }
 0x2cb   : > { %v2371_v16 = vadd.f32 %v2370_v7, %v4177_v42  ;;  %v2517_v24 = vmax.f32 %v2501_v12, 0.0 }
 0x2cd   : > { %v2462_v54 = vadd.f32 %v2438_v30, %v2371_v16 }
 0x2cf   : > { %v2482_v51 = vmul.f32 %v4200_v49, %v2462_v54 }
 0x2d1   : > { %v2502_v58 = vadd.f32 %v4210_v56, %v2482_v51 }
 0x2d2   : > { %v2373_v46 = vpop.f32.mrf.mxu3 }
 0x2d3   : > { %v2374_v2 = vadd.f32 %v2373_v46, %v4184_v40  ;;  %v2518_v3 = vmax.f32 %v2502_v58, 0.0  ;;  %v2446_v40 = vpop.f32.mrf.mxu1 }
 0x2d5   : > { %v2528_v13 = vpack.c.bf16 %v2518_v3, %v2517_v24  ;;  %v2463_v22 = vadd.f32 %v2441_v0, %v2374_v2 }
 0x2d7   : > { %2867 = vmatmul.msk.bf16.gmra.mxu2 %vm2130_vm1, %v2528_v13  ;;  %v2483_v42 = vmul.f32 %v4200_v49, %v2463_v22 }
 0x2d9   : > { %v2503_v63 = vadd.f32 %v4210_v56, %v2483_v42 }
 0x2da   : > { %v2375_v9 = vpop.f32.mrf.mxu3  ;;  %v1798_v17 = vpop.f32.mrf.mxu0 }
 0x2db   : > { %v2376_v61 = vadd.f32 %v2375_v9, %v4186_v50  ;;  %v2519_v18 = vmax.f32 %v2503_v63, 0.0  ;;  %v2448_v57 = vpop.f32.mrf.mxu1 }
 0x2dd   : > { %v2464_v62 = vadd.f32 %v2443_v47, %v2376_v61 }
 0x2df   : > { %v2484_v8 = vmul.f32 %v4200_v49, %v2464_v62 }
 0x2e1   : > { %v2504_v28 = vadd.f32 %v4210_v56, %v2484_v8 }
 0x2e2   : > { %v2378_v21 = vpop.f32.mrf.mxu3  ;;  %v1800_v19 = vpop.f32.mrf.mxu0 }
 0x2e3   : > { %v2379_v25 = vadd.f32 %v2378_v21, %v4190_v20  ;;  %v2520_v45 = vmax.f32 %v2504_v28, 0.0 }
 0x2e5   : > { %v2529_v15 = vpack.c.bf16 %v2520_v45, %v2519_v18  ;;  %v2465_v6 = vadd.f32 %v2446_v40, %v2379_v25 }
 0x2e7   : > { %2868 = vmatmul.msk.bf16.gmra.mxu2 %vm2130_vm1, %v2529_v15  ;;  %v2485_v38 = vmul.f32 %v4200_v49, %v2465_v6 }
 0x2e9   : > { %v2505_v32 = vadd.f32 %v4210_v56, %v2485_v38 }
 0x2ea   : > { %v2380_v50 = vpop.f32.mrf.mxu3 }
 0x2eb   : > { %v2381_v43 = vadd.f32 %v2380_v50, %v4192_v26  ;;  %v2521_v23 = vmax.f32 %v2505_v32, 0.0  ;;  %v4263_v26 = vld [vmem:[%s4422_s11] ss:$0 sm:$0xff] }
 0x2ec   : > { %v1842_v39 = vmul.f32 %v4263_v26, %v1798_v17  ;;  %v1843_v16 = vmul.f32 %v4263_v26, %v1800_v19  ;;  %v1844_v2 = vmul.f32 %v4263_v26, %v4117_v41  ;;  %v1845_v42 = vmul.f32 %v4263_v26, %v4128_v34 }
 0x2ed   : > { %v2466_v1 = vadd.f32 %v2448_v57, %v2381_v43  ;;  %v1846_v40 = vmul.f32 %v4263_v26, %v4131_v60  ;;  %v1847_v6 = vmul.f32 %v4263_v26, %v4139_v36  ;;  %v1848_v32 = vmul.f32 %v4263_v26, %v4146_v5 }
 0x2ee   : > { %v1849_v17 = vmul.f32 %v4263_v26, %v4151_v59 }
 0x2ef   : > { %v2486_v20 = vmul.f32 %v4200_v49, %v2466_v1  ;;  %v4270_v49 = vld [vmem:[%s4419_s8] ss:$0 sm:$0xff] }
 0x2f1   : > { %v2506_v48 = vadd.f32 %v4210_v56, %v2486_v20  ;;  %v4275_v56 = vld [vmem:[%s4423_s12] ss:$0 sm:$0xff] }
 0x2f2   : > { %v1862_v30 = vadd.f32 %v4275_v56, %v1842_v39  ;;  %v1863_v51 = vadd.f32 %v4275_v56, %v1843_v16  ;;  %v1864_v22 = vadd.f32 %v4275_v56, %v1844_v2  ;;  %v1865_v8 = vadd.f32 %v4275_v56, %v1845_v42 }
 0x2f3   : > { %v2522_v27 = vmax.f32 %v2506_v48, 0.0  ;;  %v1866_v18 = vadd.f32 %v4275_v56, %v1846_v40  ;;  %v1867_v43 = vadd.f32 %v4275_v56, %v1847_v6  ;;  %v1855_v6 = vmul.f32 %v4263_v26, %v4149_v14 }
 0x2f5   : > { %v2530_v35 = vpack.c.bf16 %v2522_v27, %v2521_v23  ;;  %v1868_v23 = vadd.f32 %v4275_v56, %v1848_v32 }
 0x2f7   : > { %2869 = vmatmul.msk.bf16.gmra.mxu2 %vm2130_vm1, %v2530_v35 }
 0x30a   : > { %v2569_v33 = vpop.f32.mrf.mxu2 }
 0x30b   : > { %v2613_v37 = vmul.f32 %v4270_v49, %v2569_v33 }
 0x30d   : > { %v2633_v7 = vadd.f32 %v4280_v52, %v2613_v37 }
 0x30f   : > { %v2649_v10 = vadd.f32 %v2633_v7, %v1862_v30  ;;  %v1869_v30 = vadd.f32 %v4275_v56, %v1849_v17  ;;  %v1850_v7 = vmul.f32 %v4263_v26, %v4158_v29 }
 0x311   : > { %v2665_v54 = vmax.f32 %v2649_v10, 0.0 }
 0x312   : > { %v2571_v0 = vpop.f32.mrf.mxu2 }
 0x313   : > { %2681 = vst.msk [vmem:[%s4289_s15] sm:$0xff] %vm1005_vm5, %v2665_v54  ;;  %v2614_v12 = vmul.f32 %v4270_v49, %v2571_v0  ;;  %v1870_v54 = vadd.f32 %v4275_v56, %v1850_v7 }
 0x315   : > { %v2634_v58 = vadd.f32 %v4280_v52, %v2614_v12  ;;  %v1851_v12 = vmul.f32 %v4263_v26, %v4162_v11 }
 0x317   : > { %v2650_v46 = vadd.f32 %v2634_v58, %v1863_v51  ;;  %v1871_v2 = vadd.f32 %v4275_v56, %v1851_v12 }
 0x319   : > { %v2666_v24 = vmax.f32 %v2650_v46, 0.0 }
 0x31a   : > { %v2574_v3 = vpop.f32.mrf.mxu2 }
 0x31b   : > { %2682 = vst.msk [vmem:[%s4289_s15 + $0x8] sm:$0xff] %vm1005_vm5, %v2666_v24  ;;  %v2615_v13 = vmul.f32 %v4270_v49, %v2574_v3 }
 0x31d   : > { %v2635_v47 = vadd.f32 %v4280_v52, %v2615_v13  ;;  %v1852_v13 = vmul.f32 %v4263_v26, %v4175_v31 }
 0x31f   : > { %v2651_v9 = vadd.f32 %v2635_v47, %v1864_v22 }
 0x321   : > { %v2667_v61 = vmax.f32 %v2651_v9, 0.0  ;;  %v1872_v9 = vadd.f32 %v4275_v56, %v1852_v13 }
 0x322   : > { %v2576_v62 = vpop.f32.mrf.mxu2 }
 0x323   : > { %2683 = vst.msk [vmem:[%s4289_s15 + $0x10] sm:$0xff] %vm1005_vm5, %v2667_v61  ;;  %v2616_v41 = vmul.f32 %v4270_v49, %v2576_v62  ;;  %v1853_v62 = vmul.f32 %v4263_v26, %v4182_v53 }
 0x325   : > { %v2636_v63 = vadd.f32 %v4280_v52, %v2616_v41 }
 0x327   : > { %v2652_v28 = vadd.f32 %v2636_v63, %v1865_v8  ;;  %v1873_v63 = vadd.f32 %v4275_v56, %v1853_v62 }
 0x329   : > { %v2668_v21 = vmax.f32 %v2652_v28, 0.0 }
 0x32a   : > { %v2579_v25 = vpop.f32.mrf.mxu2 }
 0x32b   : > { %2684 = vst.msk [vmem:[%s4289_s15 + $0x18] sm:$0xff] %vm1005_vm5, %v2668_v21  ;;  %v2617_v34 = vmul.f32 %v4270_v49, %v2579_v25  ;;  %v1854_v21 = vmul.f32 %v4263_v26, %v4142_v55 }
 0x32d   : > { %v2637_v45 = vadd.f32 %v4280_v52, %v2617_v34 }
 0x32f   : > { %v2653_v15 = vadd.f32 %v2637_v45, %v1866_v18  ;;  %v1874_v18 = vadd.f32 %v4275_v56, %v1854_v21 }
 0x331   : > { %v2669_v50 = vmax.f32 %v2653_v15, 0.0 }
 0x332   : > { %v2581_v38 = vpop.f32.mrf.mxu2 }
 0x333   : > { %2685 = vst.msk [vmem:[%s4289_s15 + $0x20] sm:$0xff] %vm1005_vm5, %v2669_v50  ;;  %v2618_v60 = vmul.f32 %v4270_v49, %v2581_v38 }
 0x335   : > { %v2638_v57 = vadd.f32 %v4280_v52, %v2618_v60  ;;  %v1875_v60 = vadd.f32 %v4275_v56, %v1855_v6 }
 0x337   : > { %v2654_v1 = vadd.f32 %v2638_v57, %v1867_v43 }
 0x339   : > { %v2670_v20 = vmax.f32 %v2654_v1, 0.0  ;;  %v1856_v1 = vmul.f32 %v4263_v26, %v4156_v44 }
 0x33a   : > { %v2584_v48 = vpop.f32.mrf.mxu2 }
 0x33b   : > { %2686 = vst.msk [vmem:[%s4289_s15 + $0x28] sm:$0xff] %vm1005_vm5, %v2670_v20  ;;  %v2619_v36 = vmul.f32 %v4270_v49, %v2584_v48  ;;  %v1876_v48 = vadd.f32 %v4275_v56, %v1856_v1 }
 0x33d   : > { %v2639_v27 = vadd.f32 %v4280_v52, %v2619_v36 }
 0x33f   : > { %v2655_v35 = vadd.f32 %v2639_v27, %v1868_v23  ;;  %v1857_v27 = vmul.f32 %v4263_v26, %v4160_v4 }
 0x341   : > { %v2671_v39 = vmax.f32 %v2655_v35, 0.0 }
 0x342   : > { %v2586_v33 = vpop.f32.mrf.mxu2 }
 0x343   : > { %2687 = vst.msk [vmem:[%s4289_s15 + $0x30] sm:$0xff] %vm1005_vm5, %v2671_v39  ;;  %v2620_v5 = vmul.f32 %v4270_v49, %v2586_v33  ;;  %v1877_v39 = vadd.f32 %v4275_v56, %v1857_v27 }
 0x345   : > { %v2640_v37 = vadd.f32 %v4280_v52, %v2620_v5 }
 0x347   : > { %v2656_v19 = vadd.f32 %v2640_v37, %v1869_v30 }
 0x349   : > { %v2672_v10 = vmax.f32 %v2656_v19, 0.0 }
 0x34a   : > { %v2589_v16 = vpop.f32.mrf.mxu2 }
 0x34b   : > { %2688 = vst.msk [vmem:[%s4289_s15 + $0x38] sm:$0xff] %vm1005_vm5, %v2672_v10  ;;  %v2621_v59 = vmul.f32 %v4270_v49, %v2589_v16 }
 0x34d   : > { %v2641_v0 = vadd.f32 %v4280_v52, %v2621_v59 }
 0x34f   : > { %v2657_v51 = vadd.f32 %v2641_v0, %v1870_v54 }
 0x351   : > { %v2673_v58 = vmax.f32 %v2657_v51, 0.0 }
 0x352   : > { %v2591_v46 = vpop.f32.mrf.mxu2 }
 0x353   : > { %2689 = vst.msk [vmem:[%s4289_s15 + $0x40] sm:$0xff] %vm1005_vm5, %v2673_v58  ;;  %v2622_v29 = vmul.f32 %v4270_v49, %v2591_v46 }
 0x355   : > { %v2642_v24 = vadd.f32 %v4280_v52, %v2622_v29 }
 0x357   : > { %v2658_v3 = vadd.f32 %v2642_v24, %v1871_v2 }
 0x359   : > { %v2674_v22 = vmax.f32 %v2658_v3, 0.0 }
 0x35a   : > { %v2594_v47 = vpop.f32.mrf.mxu2 }
 0x35b   : > { %2690 = vst.msk [vmem:[%s4289_s15 + $0x48] sm:$0xff] %vm1005_vm5, %v2674_v22  ;;  %v2623_v11 = vmul.f32 %v4270_v49, %v2594_v47 }
 0x35d   : > { %v2643_v42 = vadd.f32 %v4280_v52, %v2623_v11 }
 0x35f   : > { %v2659_v61 = vadd.f32 %v2643_v42, %v1872_v9 }
 0x361   : > { %v2675_v41 = vmax.f32 %v2659_v61, 0.0 }
 0x362   : > { %v2596_v8 = vpop.f32.mrf.mxu2 }
 0x363   : > { %2691 = vst.msk [vmem:[%s4289_s15 + $0x50] sm:$0xff] %vm1005_vm5, %v2675_v41  ;;  %v2624_v31 = vmul.f32 %v4270_v49, %v2596_v8 }
 0x365   : > { %v2644_v28 = vadd.f32 %v4280_v52, %v2624_v31 }
 0x367   : > { %v2660_v40 = vadd.f32 %v2644_v28, %v1873_v63 }
 0x369   : > { %v2676_v25 = vmax.f32 %v2660_v40, 0.0 }
 0x36a   : > { %v2599_v34 = vpop.f32.mrf.mxu2 }
 0x36b   : > { %2692 = vst.msk [vmem:[%s4289_s15 + $0x58] sm:$0xff] %vm1005_vm5, %v2676_v25  ;;  %v2625_v53 = vmul.f32 %v4270_v49, %v2599_v34 }
 0x36d   : > { %v2645_v45 = vadd.f32 %v4280_v52, %v2625_v53 }
 0x36f   : > { %v2661_v15 = vadd.f32 %v2645_v45, %v1874_v18 }
 0x371   : > { %v2677_v50 = vmax.f32 %v2661_v15, 0.0 }
 0x372   : > { %v2601_v38 = vpop.f32.mrf.mxu2 }
 0x373   : > { %2693 = vst.msk [vmem:[%s4289_s15 + $0x60] sm:$0xff] %vm1005_vm5, %v2677_v50  ;;  %v2626_v55 = vmul.f32 %v4270_v49, %v2601_v38 }
 0x375   : > { %v2646_v43 = vadd.f32 %v4280_v52, %v2626_v55 }
 0x377   : > { %v2662_v57 = vadd.f32 %v2646_v43, %v1875_v60 }
 0x379   : > { %v2678_v32 = vmax.f32 %v2662_v57, 0.0 }
 0x37a   : > { %v2604_v20 = vpop.f32.mrf.mxu2 }
 0x37b   : > { %2694 = vst.msk [vmem:[%s4289_s15 + $0x68] sm:$0xff] %vm1005_vm5, %v2678_v32  ;;  %v2627_v14 = vmul.f32 %v4270_v49, %v2604_v20 }
 0x37d   : > { %v2647_v36 = vadd.f32 %v4280_v52, %v2627_v14 }
 0x37f   : > { %v2663_v23 = vadd.f32 %v2647_v36, %v1876_v48 }
 0x381   : > { %v2679_v35 = vmax.f32 %v2663_v23, 0.0 }
 0x382   : > { %v2606_v17 = vpop.f32.mrf.mxu2 }
 0x383   : > { %2695 = vst.msk [vmem:[%s4289_s15 + $0x70] sm:$0xff] %vm1005_vm5, %v2679_v35  ;;  %v2628_v44 = vmul.f32 %v4270_v49, %v2606_v17 }
 0x385   : > { %v2648_v33 = vadd.f32 %v4280_v52, %v2628_v44 }
 0x387   : > { %v2664_v5 = vadd.f32 %v2648_v33, %v1877_v39 }
 0x389   : > { %v2680_v30 = vmax.f32 %v2664_v5, 0.0 }
 0x38b   : > { %2696 = vst.msk [vmem:[%s4289_s15 + $0x78] sm:$0xff] %vm1005_vm5, %v2680_v30 }
 0x38c PF: > { %s23_s29 = sadd.s32 1, %s3092_s29   ;;  %s4475_s25 = smov %s3084_s27 }
 0x38d   : > { %p20_p7 = scmp.ge.s32.totalorder %s23_s29, 6   ;;  %s4476_s26 = smov %s3088_s28 }
 0x38e   : > { %s4477_s27 = smov %s4480_s30  ;;  %s4478_s28 = smov %s4484_s14 }
 0x38f   :  { %22 = sbr.rel (!%p20_p7) target bundleno = 3 (0x3), region = 119 }

</bundles_post_ra>
